<compile_context>
chip_gen: v5e
topology: v5e:2x2
jax: 0.10.0
libtpu: 0.0.40
codegen_flags: <defaults>
</compile_context>

<pallas_src>
import functools

import numpy as np
import jax
import jax.numpy as jnp
from jax import lax
from jax.experimental import pallas as pl
from jax.experimental.pallas import tpu as pltpu

NUM_POINTS = 16                 # points sampled by the point refiner per image
MXU_DTYPE = jnp.float32         # set to jnp.bfloat16 on v6e/v7x for larger inputs
_OFFSETS = [(dh, dw) for dh in (-1, 0, 1) for dw in (-1, 0, 1)]


# ---------------------------------------------------------------------------
# Kernel 1: fused encoder + decoder + sigmoid + confidence / pseudo-labels
# ---------------------------------------------------------------------------
def _core_net_kernel(x_ref, masks_ref, d_ref, u_ref,
                     w1_ref, w2_ref, w3_ref, w4_ref,
                     feat_ref, out_ref, *, W):
    f32 = jnp.float32
    x = x_ref[...]                              # (Cin_pad, N)
    N = x.shape[1]
    masks = masks_ref[...]                      # (9, N) precomputed border masks

    def conv3x3(act, w_ref_):
        # "same" 3x3 conv, stride 1, zero padding: stack the 9 shifted + masked
        # taps into ONE (9*Cin, N) operand -> a single MXU matmul (bias is the
        # last weight column).  Tap pieces are 8-row aligned by construction.
        cin = act.shape[0]
        parts = []
        for k, (dh, dw) in enumerate(_OFFSETS):
            s = dh * W + dw
            t = act if s == 0 else pltpu.roll(act, shift=(-s) % N, axis=1)
            if (dh, dw) != (0, 0):
                t = t * masks[k:k + 1, :]       # zero-padding at image borders
            parts.append(t)
        w = w_ref_[...]                         # (Cout, 9*Cin + 1)
        stacked = jnp.concatenate(parts, axis=0).astype(w.dtype)   # (9*Cin, N)
        K = 9 * cin
        return (jnp.dot(w[:, :K], stacked, preferred_element_type=f32)
                + w[:, K:K + 1].astype(f32))    # folded bias column

    # ---- encoder ----
    f1 = jnp.maximum(conv3x3(x, w1_ref), 0.0)                          # (8,  N)
    # stride-2 conv == full-res conv + even-pixel selection (exact one-hot D)
    f2_full = jnp.maximum(conv3x3(f1, w2_ref), 0.0)                    # (C2, N)
    f2 = jnp.dot(f2_full, d_ref[...], preferred_element_type=f32)      # (C2, Nh)

    # ---- decoder ----
    up = jnp.dot(f2, u_ref[...], preferred_element_type=f32)           # (C2, N) nearest 2x
    cat = jnp.concatenate([f1, up], axis=0)                            # (24, N)
    dfeat = jnp.maximum(conv3x3(cat, w3_ref), 0.0)                     # (8,  N)
    w4 = w4_ref[...]                                                   # (1, 9)
    K4 = dfeat.shape[0]
    logits = (jnp.dot(w4[:, :K4], dfeat.astype(w4.dtype),
                      preferred_element_type=f32)
              + w4[:, K4:K4 + 1].astype(f32))                          # (1, N)

    prob = jax.nn.sigmoid(logits)

    feat_ref[...] = f2                           # high-res features (half spatial)
    # packed lane/sublane-dense output slab -> one dense HBM DMA
    out_ref[0:1, :] = logits
    out_ref[1:2, :] = prob
    out_ref[2:3, :] = 2.0 * jnp.abs(prob - 0.5)  # confidence mask A
    out_ref[3:4, :] = (prob > 0.5).astype(f32)   # pseudo labels Y_u
    out_ref[4:8, :] = jnp.zeros((4, N), f32)     # padding rows


# ---------------------------------------------------------------------------
# Kernel 2: fused point-refiner MLP (matmul + bias + ReLU + matmul + sigmoid),
# point axis zero-padded to a lane-dense 128 lanes by the wrapper.
# ---------------------------------------------------------------------------
def _point_mlp_kernel(x_ref, w1_ref, w2_ref, out_ref):
    f32 = jnp.float32
    x = x_ref[...]                               # (Cin, L) point features + coarse prob row
    w1 = w1_ref[...]                             # (Hdim, Cin + 1)  [last col = bias]
    w2 = w2_ref[...]                             # (1,    Hdim + 1) [last col = bias]
    k1 = x.shape[0]
    h = jnp.maximum(
        jnp.dot(w1[:, :k1], x.astype(w1.dtype), preferred_element_type=f32)
        + w1[:, k1:k1 + 1].astype(f32), 0.0)                           # (Hdim, L)
    k2 = h.shape[0]
    z = (jnp.dot(w2[:, :k2], h.astype(w2.dtype), preferred_element_type=f32)
         + w2[:, k2:k2 + 1].astype(f32))                               # (1, L)
    out_ref[0:1, :] = z
    out_ref[1:2, :] = jax.nn.sigmoid(z)
    out_ref[2:8, :] = jnp.zeros((6, z.shape[1]), f32)


def _full_spec(shape):
    return pl.BlockSpec(shape, lambda *_: (0,) * len(shape))


# ---------------------------------------------------------------------------
# Parameters (deterministic synthetic encoder / decoder / refiner)
# ---------------------------------------------------------------------------
def init_params():
    keys = jax.random.split(jax.random.PRNGKey(42), 6)

    def w(k, shape, scale=0.1):
        return scale * jax.random.normal(k, shape, jnp.float32)

    return {
        # encoder: conv3x3 4->8 (s1), conv3x3 8->16 (s2)
        "enc1_w": w(keys[0], (8, 4, 3, 3)),  "enc1_b": jnp.zeros((8,), jnp.float32),
        "enc2_w": w(keys[1], (16, 8, 3, 3)), "enc2_b": jnp.zeros((16,), jnp.float32),
        # decoder: conv3x3 (8+16)->8, conv1x1 8->1
        "dec1_w": w(keys[2], (8, 24, 3, 3)), "dec1_b": jnp.zeros((8,), jnp.float32),
        "dec2_w": w(keys[3], (1, 8, 1, 1)),  "dec2_b": jnp.zeros((1,), jnp.float32),
        # point refiner MLP: (16 high-feat chans + 1 coarse prob) -> 16 -> 1
        "mlp1_w": w(keys[4], (17, 16)),      "mlp1_b": jnp.zeros((16,), jnp.float32),
        "mlp2_w": w(keys[5], (16, 1)),       "mlp2_b": jnp.zeros((1,), jnp.float32),
    }


def _conv_taps(wconv, bias):
    # (Cout, Cin, 3, 3) -> (Cout, 9*Cin_pad + 1): tap-major column blocks, input
    # channels zero-padded to a multiple of 8 (keeps in-kernel tap stacking
    # sublane-aligned), bias folded in as the last column.
    cout, cin = wconv.shape[0], wconv.shape[1]
    cin_pad = ((cin + 7) // 8) * 8
    if cin_pad != cin:
        wconv = jnp.pad(wconv, ((0, 0), (0, cin_pad - cin), (0, 0), (0, 0)))
    w = jnp.transpose(wconv, (0, 2, 3, 1)).reshape(cout, 9 * cin_pad)
    return jnp.concatenate([w, bias.reshape(cout, 1)], axis=1).astype(MXU_DTYPE)


def prepare_kernel_params(raw):
    """Convert PyTorch-layout params to kernel-friendly 2-D bias-folded layouts."""
    return {
        "enc1_w": _conv_taps(raw["enc1_w"], raw["enc1_b"]),            # (8, 73)
        "enc2_w": _conv_taps(raw["enc2_w"], raw["enc2_b"]),            # (16, 73)
        "dec1_w": _conv_taps(raw["dec1_w"], raw["dec1_b"]),            # (8, 217)
        "dec2_w": jnp.concatenate([raw["dec2_w"].reshape(1, 8),
                                   raw["dec2_b"].reshape(1, 1)],
                                  axis=1).astype(MXU_DTYPE),           # (1, 9)
        "mlp1_w": jnp.concatenate([raw["mlp1_w"].T,
                                   raw["mlp1_b"].reshape(-1, 1)],
                                  axis=1).astype(MXU_DTYPE),           # (16, 18)
        "mlp2_w": jnp.concatenate([raw["mlp2_w"].T,
                                   raw["mlp2_b"].reshape(-1, 1)],
                                  axis=1).astype(MXU_DTYPE),           # (1, 17)
    }


@functools.lru_cache(maxsize=8)
def _grid_constants(B, H, W):
    """Host-precomputed border masks and one-hot sampling matrices (built once)."""
    Hh, Wh = H // 2, W // 2
    N, Nh = B * H * W, B * Hh * Wh
    i = np.arange(N)
    h = (i % (H * W)) // W
    w = i % W
    masks = np.zeros((9, N), np.float32)
    for k, (dh, dw) in enumerate(_OFFSETS):
        masks[k] = ((h + dh >= 0) & (h + dh < H) & (w + dw >= 0) & (w + dw < W))
    # D: (N, Nh) one-hot even-pixel (stride-2) selection
    p = np.arange(Nh)
    bh = p // (Hh * Wh)
    ho = (p % (Hh * Wh)) // Wh
    wo = p % Wh
    src = bh * H * W + (2 * ho) * W + (2 * wo)
    D = np.zeros((N, Nh), np.float32)
    D[src, p] = 1.0
    # U: (Nh, N) one-hot nearest-neighbour 2x upsample
    bf = i // (H * W)
    tgt = bf * Hh * Wh + (h // 2) * Wh + (w // 2)
    U = np.zeros((Nh, N), np.float32)
    U[tgt, i] = 1.0
    return jnp.asarray(masks), jnp.asarray(D), jnp.asarray(U)


# ---------------------------------------------------------------------------
# CoRE_Net forward (jit-compiled; two pallas_calls total)
# ---------------------------------------------------------------------------
@functools.partial(jax.jit, static_argnames=("use_refiner",))
def _forward_jit(kp, masks, D, U, x, *, use_refiner=True):
    B, Cin, H, W = x.shape
    Hh, Wh = H // 2, W // 2
    N = B * H * W
    Nh = B * Hh * Wh
    Chf = kp["enc2_w"].shape[0]                     # high-level feature channels (16)
    Cin_pad = ((Cin + 7) // 8) * 8

    # channels on sublanes, flattened (b, h, w) pixels on lanes
    x_flat = jnp.transpose(x, (1, 0, 2, 3)).reshape(Cin, N).astype(jnp.float32)
    if Cin_pad != Cin:
        x_flat = jnp.pad(x_flat, ((0, Cin_pad - Cin), (0, 0)))

    args = (x_flat, masks, D, U,
            kp["enc1_w"], kp["enc2_w"], kp["dec1_w"], kp["dec2_w"])

    conv_macs = N * sum(kp[k].shape[0] * (kp[k].shape[1] - 1)
                        for k in ("enc1_w", "enc2_w", "dec1_w", "dec2_w"))
    macs = conv_macs + 2 * Chf * N * Nh
    io_bytes = sum(int(a.size) * a.dtype.itemsize for a in args) + 4 * (Chf * Nh + 8 * N)

    feat2d, slab = pl.pallas_call(
        functools.partial(_core_net_kernel, W=W),
        out_shape=(
            jax.ShapeDtypeStruct((Chf, Nh), jnp.float32),   # features (half res)
            jax.ShapeDtypeStruct((8, N), jnp.float32),      # packed logits/prob/conf/Y_u
        ),
        # NOTE(v7x): at larger spatial sizes, split the batch axis into a
        # "parallel" grid dimension so both TensorCores are used; at 16x16 a
        # single grid step is latency-optimal and keeps every store lane-dense.
        grid=(1,),
        in_specs=[_full_spec(a.shape) for a in args],
        out_specs=(_full_spec((Chf, Nh)), _full_spec((8, N))),
        compiler_params=pltpu.CompilerParams(dimension_semantics=("arbitrary",)),
        cost_estimate=pl.CostEstimate(flops=int(2 * macs), transcendentals=int(N),
                                      bytes_accessed=int(io_bytes)),
    )(*args)

    high_feat = jnp.transpose(feat2d.reshape(Chf, B, Hh, Wh), (1, 0, 2, 3))
    coarse_logits = slab[0].reshape(B, 1, H, W)
    coarse_prob = slab[1].reshape(B, 1, H, W)

    if not use_refiner:
        return {"features": high_feat, "coarse_logits": coarse_logits,
                "coarse_mask": coarse_prob, "confidence_mask": None, "Y_u": None,
                "point_coords": None, "point_logits": None,
                "refined_mask": coarse_prob}

    A = slab[2].reshape(B, 1, H, W)
    Y_u = slab[3].reshape(B, 1, H, W)

    # ---- point refiner: batched top-k / gather + one fused, lane-padded MLP ----
    conf_b = slab[2].reshape(B, H * W)
    prob_b = slab[1].reshape(B, H * W)
    _, idx = lax.top_k(1.0 - conf_b, NUM_POINTS)                 # (B, Np) most uncertain
    rows = (idx // W).astype(jnp.int32)
    cols = (idx % W).astype(jnp.int32)
    point_coords = jnp.stack([rows, cols], axis=-1)              # (B, Np, 2)

    hf_flat = jnp.transpose(feat2d.reshape(Chf, B, Hh * Wh), (1, 0, 2))   # (B,Chf,Hh*Wh)
    idx_half = (rows // 2) * Wh + (cols // 2)                             # (B, Np)
    pf = jnp.take_along_axis(hf_flat, idx_half[:, None, :], axis=2)       # (B, Chf, Np)
    pp = jnp.take_along_axis(prob_b, idx, axis=1)                         # (B, Np)

    P = B * NUM_POINTS
    Lp = ((P + 127) // 128) * 128                                # pad to lane-dense width
    featT = jnp.concatenate(
        [jnp.transpose(pf, (1, 0, 2)).reshape(Chf, P),
         pp.reshape(1, P)], axis=0)                              # (Chf+1, P)
    featT = jnp.pad(featT, ((0, 0), (0, Lp - P)))                # (Chf+1, Lp)

    mlp_out = pl.pallas_call(
        _point_mlp_kernel,
        out_shape=jax.ShapeDtypeStruct((8, Lp), jnp.float32),
        grid=(1,),
        in_specs=[_full_spec(featT.shape), _full_spec(kp["mlp1_w"].shape),
                  _full_spec(kp["mlp2_w"].shape)],
        out_specs=_full_spec((8, Lp)),
        compiler_params=pltpu.CompilerParams(dimension_semantics=("arbitrary",)),
    )(featT, kp["mlp1_w"], kp["mlp2_w"])

    point_logits = mlp_out[0, :P].reshape(B, NUM_POINTS, 1)
    point_vals = mlp_out[1, :P]                                  # sigmoid(point_logits)

    # single batched scatter of refined point probabilities
    gidx = (jnp.arange(B, dtype=jnp.int32)[:, None] * (H * W) + idx).reshape(-1)
    refined_mask = slab[1].reshape(N).at[gidx].set(point_vals).reshape(B, 1, H, W)

    return {"features": high_feat, "coarse_logits": coarse_logits,
            "coarse_mask": coarse_prob, "confidence_mask": A, "Y_u": Y_u,
            "point_coords": point_coords, "point_logits": point_logits,
            "refined_mask": refined_mask}


def core_net_forward(kp, x, use_refiner=True):
    B, _, H, W = x.shape
    assert H % 2 == 0 and W % 2 == 0, "even H, W expected"
    masks, D, U = _grid_constants(B, H, W)
    res = _forward_jit(kp, masks, D, U, x, use_refiner=use_refiner)
    out = dict(res)
    if use_refiner:
        # per-image lists, matching the PyTorch module's API
        out["point_coords"] = [res["point_coords"][i] for i in range(B)]
        out["point_logits"] = [res["point_logits"][i] for i in range(B)]
    return out


# ---------------------------------------------------------------------------
if __name__ == "__main__":
    key = jax.random.PRNGKey(0)
    x = jax.random.normal(key, (2, 4, 16, 16), jnp.float32)   # NCHW, like PyTorch
    params = prepare_kernel_params(init_params())

    out = core_net_forward(params, x, use_refiner=True)
    jax.block_until_ready(out["refined_mask"])
    jax.block_until_ready(out["coarse_logits"])
    jax.block_until_ready(out["confidence_mask"])

    assert out["features"].shape == (2, 16, 8, 8)
    assert out["coarse_logits"].shape == (2, 1, 16, 16)
    assert out["coarse_mask"].shape == (2, 1, 16, 16)
    assert out["confidence_mask"].shape == (2, 1, 16, 16)
    assert out["Y_u"].shape == (2, 1, 16, 16)
    assert out["refined_mask"].shape == (2, 1, 16, 16)
    assert out["point_coords"][0].shape == (NUM_POINTS, 2)
    assert out["point_logits"][0].shape == (NUM_POINTS, 1)
    print("KERNEL_OK")
</pallas_src>

<mosaic_0001>
module attributes {stable_mosaic.version = 11 : i64} {
  func.func @_core_net_kernel(%arg0: i32, %arg1: memref<8x512xf32, #tpu.memory_space<vmem>>, %arg2: memref<9x512xf32, #tpu.memory_space<vmem>>, %arg3: memref<512x128xf32, #tpu.memory_space<vmem>>, %arg4: memref<128x512xf32, #tpu.memory_space<vmem>>, %arg5: memref<8x73xf32, #tpu.memory_space<vmem>>, %arg6: memref<16x73xf32, #tpu.memory_space<vmem>>, %arg7: memref<8x217xf32, #tpu.memory_space<vmem>>, %arg8: memref<1x9xf32, #tpu.memory_space<vmem>>, %arg9: memref<16x128xf32, #tpu.memory_space<vmem>>, %arg10: memref<8x512xf32, #tpu.memory_space<vmem>>) attributes {dimension_semantics = [#tpu.dimension_semantics<arbitrary>], iteration_bounds = array<i64: 1>, scalar_prefetch = 0 : i64, scratch_operands = 0 : i64, tpu.core_type = #tpu.core_type<tc>, window_params = [{pipeline_mode = #tpu.pipeline_mode<synchronous>, transform_indices = @transform_0, window_bounds = array<i64: 8, 512>}, {pipeline_mode = #tpu.pipeline_mode<synchronous>, transform_indices = @transform_1, window_bounds = array<i64: 9, 512>}, {pipeline_mode = #tpu.pipeline_mode<synchronous>, transform_indices = @transform_2, window_bounds = array<i64: 512, 128>}, {pipeline_mode = #tpu.pipeline_mode<synchronous>, transform_indices = @transform_3, window_bounds = array<i64: 128, 512>}, {pipeline_mode = #tpu.pipeline_mode<synchronous>, transform_indices = @transform_4, window_bounds = array<i64: 8, 73>}, {pipeline_mode = #tpu.pipeline_mode<synchronous>, transform_indices = @transform_5, window_bounds = array<i64: 16, 73>}, {pipeline_mode = #tpu.pipeline_mode<synchronous>, transform_indices = @transform_6, window_bounds = array<i64: 8, 217>}, {pipeline_mode = #tpu.pipeline_mode<synchronous>, transform_indices = @transform_7, window_bounds = array<i64: 1, 9>}, {pipeline_mode = #tpu.pipeline_mode<synchronous>, transform_indices = @transform_8, window_bounds = array<i64: 16, 128>}, {pipeline_mode = #tpu.pipeline_mode<synchronous>, transform_indices = @transform_9, window_bounds = array<i64: 8, 512>}]} {
    %c0 = arith.constant 0 : index
    %c0_0 = arith.constant 0 : index
    %0 = vector.load %arg1[%c0, %c0_0] : memref<8x512xf32, #tpu.memory_space<vmem>>, vector<8x512xf32>
    %c0_1 = arith.constant 0 : index
    %c0_2 = arith.constant 0 : index
    %1 = vector.load %arg2[%c0_1, %c0_2] : memref<9x512xf32, #tpu.memory_space<vmem>>, vector<9x512xf32>
    %c17_i32 = arith.constant 17 : i32
    %2 = tpu.dynamic_rotate %0 by %c17_i32 dim 1 : vector<8x512xf32>, i32 -> vector<8x512xf32>
    %3 = vector.extract_strided_slice %1 {offsets = [0, 0], sizes = [1, 512], strides = [1, 1]} : vector<9x512xf32> to vector<1x512xf32>
    %4 = vector.broadcast %3 : vector<1x512xf32> to vector<8x512xf32>
    %5 = arith.mulf %2, %4 : vector<8x512xf32>
    %c16_i32 = arith.constant 16 : i32
    %6 = tpu.dynamic_rotate %0 by %c16_i32 dim 1 : vector<8x512xf32>, i32 -> vector<8x512xf32>
    %7 = vector.extract_strided_slice %1 {offsets = [1, 0], sizes = [1, 512], strides = [1, 1]} : vector<9x512xf32> to vector<1x512xf32>
    %8 = vector.broadcast %7 : vector<1x512xf32> to vector<8x512xf32>
    %9 = arith.mulf %6, %8 : vector<8x512xf32>
    %c15_i32 = arith.constant 15 : i32
    %10 = tpu.dynamic_rotate %0 by %c15_i32 dim 1 : vector<8x512xf32>, i32 -> vector<8x512xf32>
    %11 = vector.extract_strided_slice %1 {offsets = [2, 0], sizes = [1, 512], strides = [1, 1]} : vector<9x512xf32> to vector<1x512xf32>
    %12 = vector.broadcast %11 : vector<1x512xf32> to vector<8x512xf32>
    %13 = arith.mulf %10, %12 : vector<8x512xf32>
    %c1_i32 = arith.constant 1 : i32
    %14 = tpu.dynamic_rotate %0 by %c1_i32 dim 1 : vector<8x512xf32>, i32 -> vector<8x512xf32>
    %15 = vector.extract_strided_slice %1 {offsets = [3, 0], sizes = [1, 512], strides = [1, 1]} : vector<9x512xf32> to vector<1x512xf32>
    %16 = vector.broadcast %15 : vector<1x512xf32> to vector<8x512xf32>
    %17 = arith.mulf %14, %16 : vector<8x512xf32>
    %c511_i32 = arith.constant 511 : i32
    %18 = tpu.dynamic_rotate %0 by %c511_i32 dim 1 : vector<8x512xf32>, i32 -> vector<8x512xf32>
    %19 = vector.extract_strided_slice %1 {offsets = [5, 0], sizes = [1, 512], strides = [1, 1]} : vector<9x512xf32> to vector<1x512xf32>
    %20 = vector.broadcast %19 : vector<1x512xf32> to vector<8x512xf32>
    %21 = arith.mulf %18, %20 : vector<8x512xf32>
    %c497_i32 = arith.constant 497 : i32
    %22 = tpu.dynamic_rotate %0 by %c497_i32 dim 1 : vector<8x512xf32>, i32 -> vector<8x512xf32>
    %23 = vector.extract_strided_slice %1 {offsets = [6, 0], sizes = [1, 512], strides = [1, 1]} : vector<9x512xf32> to vector<1x512xf32>
    %24 = vector.broadcast %23 : vector<1x512xf32> to vector<8x512xf32>
    %25 = arith.mulf %22, %24 : vector<8x512xf32>
    %c496_i32 = arith.constant 496 : i32
    %26 = tpu.dynamic_rotate %0 by %c496_i32 dim 1 : vector<8x512xf32>, i32 -> vector<8x512xf32>
    %27 = vector.extract_strided_slice %1 {offsets = [7, 0], sizes = [1, 512], strides = [1, 1]} : vector<9x512xf32> to vector<1x512xf32>
    %28 = vector.broadcast %27 : vector<1x512xf32> to vector<8x512xf32>
    %29 = arith.mulf %26, %28 : vector<8x512xf32>
    %c495_i32 = arith.constant 495 : i32
    %30 = tpu.dynamic_rotate %0 by %c495_i32 dim 1 : vector<8x512xf32>, i32 -> vector<8x512xf32>
    %31 = vector.extract_strided_slice %1 {offsets = [8, 0], sizes = [1, 512], strides = [1, 1]} : vector<9x512xf32> to vector<1x512xf32>
    %32 = vector.broadcast %31 : vector<1x512xf32> to vector<8x512xf32>
    %33 = arith.mulf %30, %32 : vector<8x512xf32>
    %c0_3 = arith.constant 0 : index
    %c0_4 = arith.constant 0 : index
    %34 = vector.load %arg5[%c0_3, %c0_4] : memref<8x73xf32, #tpu.memory_space<vmem>>, vector<8x73xf32>
    %35 = tpu.concatenate %5, %9, %13, %17, %0, %21, %25, %29, %33 in 0 : vector<8x512xf32>, vector<8x512xf32>, vector<8x512xf32>, vector<8x512xf32>, vector<8x512xf32>, vector<8x512xf32>, vector<8x512xf32>, vector<8x512xf32>, vector<8x512xf32> -> vector<72x512xf32>
    %36 = vector.extract_strided_slice %34 {offsets = [0, 0], sizes = [8, 72], strides = [1, 1]} : vector<8x73xf32> to vector<8x72xf32>
    %cst = arith.constant dense<0.000000e+00> : vector<8x512xf32>
    %37 = tpu.matmul %36, %35, %cst {dimension_numbers = #tpu.dot_dimension_numbers<[1], [0], [0], [1], [0, 0, 1, 1], [], []>} : vector<8x72xf32>, vector<72x512xf32>, vector<8x512xf32> -> vector<8x512xf32>
    %38 = vector.extract_strided_slice %34 {offsets = [0, 72], sizes = [8, 1], strides = [1, 1]} : vector<8x73xf32> to vector<8x1xf32>
    %39 = vector.broadcast %38 : vector<8x1xf32> to vector<8x512xf32>
    %40 = arith.addf %37, %39 : vector<8x512xf32>
    %cst_5 = arith.constant 0.000000e+00 : f32
    %41 = vector.broadcast %cst_5 : f32 to vector<8x512xf32>
    %42 = arith.maximumf %40, %41 : vector<8x512xf32>
    %c17_i32_6 = arith.constant 17 : i32
    %43 = tpu.dynamic_rotate %42 by %c17_i32_6 dim 1 : vector<8x512xf32>, i32 -> vector<8x512xf32>
    %44 = vector.extract_strided_slice %1 {offsets = [0, 0], sizes = [1, 512], strides = [1, 1]} : vector<9x512xf32> to vector<1x512xf32>
    %45 = vector.broadcast %44 : vector<1x512xf32> to vector<8x512xf32>
    %46 = arith.mulf %43, %45 : vector<8x512xf32>
    %c16_i32_7 = arith.constant 16 : i32
    %47 = tpu.dynamic_rotate %42 by %c16_i32_7 dim 1 : vector<8x512xf32>, i32 -> vector<8x512xf32>
    %48 = vector.extract_strided_slice %1 {offsets = [1, 0], sizes = [1, 512], strides = [1, 1]} : vector<9x512xf32> to vector<1x512xf32>
    %49 = vector.broadcast %48 : vector<1x512xf32> to vector<8x512xf32>
    %50 = arith.mulf %47, %49 : vector<8x512xf32>
    %c15_i32_8 = arith.constant 15 : i32
    %51 = tpu.dynamic_rotate %42 by %c15_i32_8 dim 1 : vector<8x512xf32>, i32 -> vector<8x512xf32>
    %52 = vector.extract_strided_slice %1 {offsets = [2, 0], sizes = [1, 512], strides = [1, 1]} : vector<9x512xf32> to vector<1x512xf32>
    %53 = vector.broadcast %52 : vector<1x512xf32> to vector<8x512xf32>
    %54 = arith.mulf %51, %53 : vector<8x512xf32>
    %c1_i32_9 = arith.constant 1 : i32
    %55 = tpu.dynamic_rotate %42 by %c1_i32_9 dim 1 : vector<8x512xf32>, i32 -> vector<8x512xf32>
    %56 = vector.extract_strided_slice %1 {offsets = [3, 0], sizes = [1, 512], strides = [1, 1]} : vector<9x512xf32> to vector<1x512xf32>
    %57 = vector.broadcast %56 : vector<1x512xf32> to vector<8x512xf32>
    %58 = arith.mulf %55, %57 : vector<8x512xf32>
    %c511_i32_10 = arith.constant 511 : i32
    %59 = tpu.dynamic_rotate %42 by %c511_i32_10 dim 1 : vector<8x512xf32>, i32 -> vector<8x512xf32>
    %60 = vector.extract_strided_slice %1 {offsets = [5, 0], sizes = [1, 512], strides = [1, 1]} : vector<9x512xf32> to vector<1x512xf32>
    %61 = vector.broadcast %60 : vector<1x512xf32> to vector<8x512xf32>
    %62 = arith.mulf %59, %61 : vector<8x512xf32>
    %c497_i32_11 = arith.constant 497 : i32
    %63 = tpu.dynamic_rotate %42 by %c497_i32_11 dim 1 : vector<8x512xf32>, i32 -> vector<8x512xf32>
    %64 = vector.extract_strided_slice %1 {offsets = [6, 0], sizes = [1, 512], strides = [1, 1]} : vector<9x512xf32> to vector<1x512xf32>
    %65 = vector.broadcast %64 : vector<1x512xf32> to vector<8x512xf32>
    %66 = arith.mulf %63, %65 : vector<8x512xf32>
    %c496_i32_12 = arith.constant 496 : i32
    %67 = tpu.dynamic_rotate %42 by %c496_i32_12 dim 1 : vector<8x512xf32>, i32 -> vector<8x512xf32>
    %68 = vector.extract_strided_slice %1 {offsets = [7, 0], sizes = [1, 512], strides = [1, 1]} : vector<9x512xf32> to vector<1x512xf32>
    %69 = vector.broadcast %68 : vector<1x512xf32> to vector<8x512xf32>
    %70 = arith.mulf %67, %69 : vector<8x512xf32>
    %c495_i32_13 = arith.constant 495 : i32
    %71 = tpu.dynamic_rotate %42 by %c495_i32_13 dim 1 : vector<8x512xf32>, i32 -> vector<8x512xf32>
    %72 = vector.extract_strided_slice %1 {offsets = [8, 0], sizes = [1, 512], strides = [1, 1]} : vector<9x512xf32> to vector<1x512xf32>
    %73 = vector.broadcast %72 : vector<1x512xf32> to vector<8x512xf32>
    %74 = arith.mulf %71, %73 : vector<8x512xf32>
    %c0_14 = arith.constant 0 : index
    %c0_15 = arith.constant 0 : index
    %75 = vector.load %arg6[%c0_14, %c0_15] : memref<16x73xf32, #tpu.memory_space<vmem>>, vector<16x73xf32>
    %76 = tpu.concatenate %46, %50, %54, %58, %42, %62, %66, %70, %74 in 0 : vector<8x512xf32>, vector<8x512xf32>, vector<8x512xf32>, vector<8x512xf32>, vector<8x512xf32>, vector<8x512xf32>, vector<8x512xf32>, vector<8x512xf32>, vector<8x512xf32> -> vector<72x512xf32>
    %77 = vector.extract_strided_slice %75 {offsets = [0, 0], sizes = [16, 72], strides = [1, 1]} : vector<16x73xf32> to vector<16x72xf32>
    %cst_16 = arith.constant dense<0.000000e+00> : vector<16x512xf32>
    %78 = tpu.matmul %77, %76, %cst_16 {dimension_numbers = #tpu.dot_dimension_numbers<[1], [0], [0], [1], [0, 0, 1, 1], [], []>} : vector<16x72xf32>, vector<72x512xf32>, vector<16x512xf32> -> vector<16x512xf32>
    %79 = vector.extract_strided_slice %75 {offsets = [0, 72], sizes = [16, 1], strides = [1, 1]} : vector<16x73xf32> to vector<16x1xf32>
    %80 = vector.broadcast %79 : vector<16x1xf32> to vector<16x512xf32>
    %81 = arith.addf %78, %80 : vector<16x512xf32>
    %cst_17 = arith.constant 0.000000e+00 : f32
    %82 = vector.broadcast %cst_17 : f32 to vector<16x512xf32>
    %83 = arith.maximumf %81, %82 : vector<16x512xf32>
    %c0_18 = arith.constant 0 : index
    %c0_19 = arith.constant 0 : index
    %84 = vector.load %arg3[%c0_18, %c0_19] : memref<512x128xf32, #tpu.memory_space<vmem>>, vector<512x128xf32>
    %cst_20 = arith.constant dense<0.000000e+00> : vector<16x128xf32>
    %85 = tpu.matmul %83, %84, %cst_20 {dimension_numbers = #tpu.dot_dimension_numbers<[1], [0], [0], [1], [0, 0, 1, 1], [], []>} : vector<16x512xf32>, vector<512x128xf32>, vector<16x128xf32> -> vector<16x128xf32>
    %c0_21 = arith.constant 0 : index
    %c0_22 = arith.constant 0 : index
    %86 = vector.load %arg4[%c0_21, %c0_22] : memref<128x512xf32, #tpu.memory_space<vmem>>, vector<128x512xf32>
    %cst_23 = arith.constant dense<0.000000e+00> : vector<16x512xf32>
    %87 = tpu.matmul %85, %86, %cst_23 {dimension_numbers = #tpu.dot_dimension_numbers<[1], [0], [0], [1], [0, 0, 1, 1], [], []>} : vector<16x128xf32>, vector<128x512xf32>, vector<16x512xf32> -> vector<16x512xf32>
    %88 = tpu.concatenate %42, %87 in 0 : vector<8x512xf32>, vector<16x512xf32> -> vector<24x512xf32>
    %c17_i32_24 = arith.constant 17 : i32
    %89 = tpu.dynamic_rotate %88 by %c17_i32_24 dim 1 : vector<24x512xf32>, i32 -> vector<24x512xf32>
    %90 = vector.extract_strided_slice %1 {offsets = [0, 0], sizes = [1, 512], strides = [1, 1]} : vector<9x512xf32> to vector<1x512xf32>
    %91 = vector.broadcast %90 : vector<1x512xf32> to vector<24x512xf32>
    %92 = arith.mulf %89, %91 : vector<24x512xf32>
    %c16_i32_25 = arith.constant 16 : i32
    %93 = tpu.dynamic_rotate %88 by %c16_i32_25 dim 1 : vector<24x512xf32>, i32 -> vector<24x512xf32>
    %94 = vector.extract_strided_slice %1 {offsets = [1, 0], sizes = [1, 512], strides = [1, 1]} : vector<9x512xf32> to vector<1x512xf32>
    %95 = vector.broadcast %94 : vector<1x512xf32> to vector<24x512xf32>
    %96 = arith.mulf %93, %95 : vector<24x512xf32>
    %c15_i32_26 = arith.constant 15 : i32
    %97 = tpu.dynamic_rotate %88 by %c15_i32_26 dim 1 : vector<24x512xf32>, i32 -> vector<24x512xf32>
    %98 = vector.extract_strided_slice %1 {offsets = [2, 0], sizes = [1, 512], strides = [1, 1]} : vector<9x512xf32> to vector<1x512xf32>
    %99 = vector.broadcast %98 : vector<1x512xf32> to vector<24x512xf32>
    %100 = arith.mulf %97, %99 : vector<24x512xf32>
    %c1_i32_27 = arith.constant 1 : i32
    %101 = tpu.dynamic_rotate %88 by %c1_i32_27 dim 1 : vector<24x512xf32>, i32 -> vector<24x512xf32>
    %102 = vector.extract_strided_slice %1 {offsets = [3, 0], sizes = [1, 512], strides = [1, 1]} : vector<9x512xf32> to vector<1x512xf32>
    %103 = vector.broadcast %102 : vector<1x512xf32> to vector<24x512xf32>
    %104 = arith.mulf %101, %103 : vector<24x512xf32>
    %c511_i32_28 = arith.constant 511 : i32
    %105 = tpu.dynamic_rotate %88 by %c511_i32_28 dim 1 : vector<24x512xf32>, i32 -> vector<24x512xf32>
    %106 = vector.extract_strided_slice %1 {offsets = [5, 0], sizes = [1, 512], strides = [1, 1]} : vector<9x512xf32> to vector<1x512xf32>
    %107 = vector.broadcast %106 : vector<1x512xf32> to vector<24x512xf32>
    %108 = arith.mulf %105, %107 : vector<24x512xf32>
    %c497_i32_29 = arith.constant 497 : i32
    %109 = tpu.dynamic_rotate %88 by %c497_i32_29 dim 1 : vector<24x512xf32>, i32 -> vector<24x512xf32>
    %110 = vector.extract_strided_slice %1 {offsets = [6, 0], sizes = [1, 512], strides = [1, 1]} : vector<9x512xf32> to vector<1x512xf32>
    %111 = vector.broadcast %110 : vector<1x512xf32> to vector<24x512xf32>
    %112 = arith.mulf %109, %111 : vector<24x512xf32>
    %c496_i32_30 = arith.constant 496 : i32
    %113 = tpu.dynamic_rotate %88 by %c496_i32_30 dim 1 : vector<24x512xf32>, i32 -> vector<24x512xf32>
    %114 = vector.extract_strided_slice %1 {offsets = [7, 0], sizes = [1, 512], strides = [1, 1]} : vector<9x512xf32> to vector<1x512xf32>
    %115 = vector.broadcast %114 : vector<1x512xf32> to vector<24x512xf32>
    %116 = arith.mulf %113, %115 : vector<24x512xf32>
    %c495_i32_31 = arith.constant 495 : i32
    %117 = tpu.dynamic_rotate %88 by %c495_i32_31 dim 1 : vector<24x512xf32>, i32 -> vector<24x512xf32>
    %118 = vector.extract_strided_slice %1 {offsets = [8, 0], sizes = [1, 512], strides = [1, 1]} : vector<9x512xf32> to vector<1x512xf32>
    %119 = vector.broadcast %118 : vector<1x512xf32> to vector<24x512xf32>
    %120 = arith.mulf %117, %119 : vector<24x512xf32>
    %c0_32 = arith.constant 0 : index
    %c0_33 = arith.constant 0 : index
    %121 = vector.load %arg7[%c0_32, %c0_33] : memref<8x217xf32, #tpu.memory_space<vmem>>, vector<8x217xf32>
    %122 = tpu.concatenate %92, %96, %100, %104, %88, %108, %112, %116, %120 in 0 : vector<24x512xf32>, vector<24x512xf32>, vector<24x512xf32>, vector<24x512xf32>, vector<24x512xf32>, vector<24x512xf32>, vector<24x512xf32>, vector<24x512xf32>, vector<24x512xf32> -> vector<216x512xf32>
    %123 = vector.extract_strided_slice %121 {offsets = [0, 0], sizes = [8, 216], strides = [1, 1]} : vector<8x217xf32> to vector<8x216xf32>
    %cst_34 = arith.constant dense<0.000000e+00> : vector<8x512xf32>
    %124 = tpu.matmul %123, %122, %cst_34 {dimension_numbers = #tpu.dot_dimension_numbers<[1], [0], [0], [1], [0, 0, 1, 1], [], []>} : vector<8x216xf32>, vector<216x512xf32>, vector<8x512xf32> -> vector<8x512xf32>
    %125 = vector.extract_strided_slice %121 {offsets = [0, 216], sizes = [8, 1], strides = [1, 1]} : vector<8x217xf32> to vector<8x1xf32>
    %126 = vector.broadcast %125 : vector<8x1xf32> to vector<8x512xf32>
    %127 = arith.addf %124, %126 : vector<8x512xf32>
    %cst_35 = arith.constant 0.000000e+00 : f32
    %128 = vector.broadcast %cst_35 : f32 to vector<8x512xf32>
    %129 = arith.maximumf %127, %128 : vector<8x512xf32>
    %c0_36 = arith.constant 0 : index
    %c0_37 = arith.constant 0 : index
    %130 = vector.load %arg8[%c0_36, %c0_37] : memref<1x9xf32, #tpu.memory_space<vmem>>, vector<1x9xf32>
    %131 = vector.extract_strided_slice %130 {offsets = [0, 0], sizes = [1, 8], strides = [1, 1]} : vector<1x9xf32> to vector<1x8xf32>
    %cst_38 = arith.constant dense<0.000000e+00> : vector<1x512xf32>
    %132 = tpu.matmul %131, %129, %cst_38 {dimension_numbers = #tpu.dot_dimension_numbers<[1], [0], [0], [1], [0, 0, 1, 1], [], []>} : vector<1x8xf32>, vector<8x512xf32>, vector<1x512xf32> -> vector<1x512xf32>
    %133 = vector.extract_strided_slice %130 {offsets = [0, 8], sizes = [1, 1], strides = [1, 1]} : vector<1x9xf32> to vector<1x1xf32>
    %134 = vector.broadcast %133 : vector<1x1xf32> to vector<1x512xf32>
    %135 = arith.addf %132, %134 : vector<1x512xf32>
    %136 = arith.negf %135 : vector<1x512xf32>
    %137 = math.exp %136 : vector<1x512xf32>
    %cst_39 = arith.constant 1.000000e+00 : f32
    %138 = vector.broadcast %cst_39 : f32 to vector<1x512xf32>
    %139 = arith.addf %138, %137 : vector<1x512xf32>
    %140 = arith.divf %138, %139 : vector<1x512xf32>
    %c0_40 = arith.constant 0 : index
    %c0_41 = arith.constant 0 : index
    %141 = vector.load %arg9[%c0_40, %c0_41] : memref<16x128xf32, #tpu.memory_space<vmem>>, vector<16x128xf32>
    tpu.vector_store %arg9[%c0_40, %c0_41], %85 {strides = array<i32>} : memref<16x128xf32, #tpu.memory_space<vmem>>, vector<16x128xf32>,
    %c0_42 = arith.constant 0 : index
    %c0_43 = arith.constant 0 : index
    %142 = vector.load %arg10[%c0_42, %c0_43] : memref<8x512xf32, #tpu.memory_space<vmem>>, vector<1x512xf32>
    tpu.vector_store %arg10[%c0_42, %c0_43], %135 {strides = array<i32>} : memref<8x512xf32, #tpu.memory_space<vmem>>, vector<1x512xf32>,
    %c1 = arith.constant 1 : index
    %c0_44 = arith.constant 0 : index
    %143 = vector.load %arg10[%c1, %c0_44] : memref<8x512xf32, #tpu.memory_space<vmem>>, vector<1x512xf32>
    tpu.vector_store %arg10[%c1, %c0_44], %140 {strides = array<i32>} : memref<8x512xf32, #tpu.memory_space<vmem>>, vector<1x512xf32>,
    %cst_45 = arith.constant 5.000000e-01 : f32
    %144 = vector.broadcast %cst_45 : f32 to vector<1x512xf32>
    %145 = arith.subf %140, %144 : vector<1x512xf32>
    %146 = math.absf %145 : vector<1x512xf32>
    %cst_46 = arith.constant 2.000000e+00 : f32
    %147 = vector.broadcast %cst_46 : f32 to vector<1x512xf32>
    %148 = arith.mulf %147, %146 : vector<1x512xf32>
    %c2 = arith.constant 2 : index
    %c0_47 = arith.constant 0 : index
    %149 = vector.load %arg10[%c2, %c0_47] : memref<8x512xf32, #tpu.memory_space<vmem>>, vector<1x512xf32>
    tpu.vector_store %arg10[%c2, %c0_47], %148 {strides = array<i32>} : memref<8x512xf32, #tpu.memory_space<vmem>>, vector<1x512xf32>,
    %cst_48 = arith.constant 5.000000e-01 : f32
    %150 = vector.broadcast %cst_48 : f32 to vector<1x512xf32>
    %151 = arith.cmpf ogt, %140, %150 : vector<1x512xf32>
    %152 = arith.extui %151 : vector<1x512xi1> to vector<1x512xi32>
    %153 = arith.sitofp %152 : vector<1x512xi32> to vector<1x512xf32>
    %c3 = arith.constant 3 : index
    %c0_49 = arith.constant 0 : index
    %154 = vector.load %arg10[%c3, %c0_49] : memref<8x512xf32, #tpu.memory_space<vmem>>, vector<1x512xf32>
    tpu.vector_store %arg10[%c3, %c0_49], %153 {strides = array<i32>} : memref<8x512xf32, #tpu.memory_space<vmem>>, vector<1x512xf32>,
    %cst_50 = arith.constant 0.000000e+00 : f32
    %155 = vector.broadcast %cst_50 : f32 to vector<4x512xf32>
    %c4 = arith.constant 4 : index
    %c0_51 = arith.constant 0 : index
    %156 = vector.load %arg10[%c4, %c0_51] : memref<8x512xf32, #tpu.memory_space<vmem>>, vector<4x512xf32>
    tpu.vector_store %arg10[%c4, %c0_51], %155 {strides = array<i32>} : memref<8x512xf32, #tpu.memory_space<vmem>>, vector<4x512xf32>,
    return
  }
  func.func @transform_0(%arg0: i32) -> (i32, i32) {
    %c0_i32 = arith.constant 0 : i32
    %c0_i32_0 = arith.constant 0 : i32
    %c0_i32_1 = arith.constant 0 : i32
    return %c0_i32, %c0_i32_0 : i32, i32
  }
  func.func @transform_1(%arg0: i32) -> (i32, i32) {
    %c0_i32 = arith.constant 0 : i32
    %c0_i32_0 = arith.constant 0 : i32
    %c0_i32_1 = arith.constant 0 : i32
    return %c0_i32, %c0_i32_0 : i32, i32
  }
  func.func @transform_2(%arg0: i32) -> (i32, i32) {
    %c0_i32 = arith.constant 0 : i32
    %c0_i32_0 = arith.constant 0 : i32
    %c0_i32_1 = arith.constant 0 : i32
    return %c0_i32, %c0_i32_0 : i32, i32
  }
  func.func @transform_3(%arg0: i32) -> (i32, i32) {
    %c0_i32 = arith.constant 0 : i32
    %c0_i32_0 = arith.constant 0 : i32
    %c0_i32_1 = arith.constant 0 : i32
    return %c0_i32, %c0_i32_0 : i32, i32
  }
  func.func @transform_4(%arg0: i32) -> (i32, i32) {
    %c0_i32 = arith.constant 0 : i32
    %c0_i32_0 = arith.constant 0 : i32
    %c0_i32_1 = arith.constant 0 : i32
    return %c0_i32, %c0_i32_0 : i32, i32
  }
  func.func @transform_5(%arg0: i32) -> (i32, i32) {
    %c0_i32 = arith.constant 0 : i32
    %c0_i32_0 = arith.constant 0 : i32
    %c0_i32_1 = arith.constant 0 : i32
    return %c0_i32, %c0_i32_0 : i32, i32
  }
  func.func @transform_6(%arg0: i32) -> (i32, i32) {
    %c0_i32 = arith.constant 0 : i32
    %c0_i32_0 = arith.constant 0 : i32
    %c0_i32_1 = arith.constant 0 : i32
    return %c0_i32, %c0_i32_0 : i32, i32
  }
  func.func @transform_7(%arg0: i32) -> (i32, i32) {
    %c0_i32 = arith.constant 0 : i32
    %c0_i32_0 = arith.constant 0 : i32
    %c0_i32_1 = arith.constant 0 : i32
    return %c0_i32, %c0_i32_0 : i32, i32
  }
  func.func @transform_8(%arg0: i32) -> (i32, i32) {
    %c0_i32 = arith.constant 0 : i32
    %c0_i32_0 = arith.constant 0 : i32
    %c0_i32_1 = arith.constant 0 : i32
    return %c0_i32, %c0_i32_0 : i32, i32
  }
  func.func @transform_9(%arg0: i32) -> (i32, i32) {
    %c0_i32 = arith.constant 0 : i32
    %c0_i32_0 = arith.constant 0 : i32
    %c0_i32_1 = arith.constant 0 : i32
    return %c0_i32, %c0_i32_0 : i32, i32
  }
}

module attributes {stable_mosaic.version = 11 : i64} {
  func.func @_point_mlp_kernel(%arg0: i32, %arg1: memref<17x128xf32, #tpu.memory_space<vmem>>, %arg2: memref<16x18xf32, #tpu.memory_space<vmem>>, %arg3: memref<1x17xf32, #tpu.memory_space<vmem>>, %arg4: memref<8x128xf32, #tpu.memory_space<vmem>>) attributes {dimension_semantics = [#tpu.dimension_semantics<arbitrary>], iteration_bounds = array<i64: 1>, scalar_prefetch = 0 : i64, scratch_operands = 0 : i64, tpu.core_type = #tpu.core_type<tc>, window_params = [{pipeline_mode = #tpu.pipeline_mode<synchronous>, transform_indices = @transform_0, window_bounds = array<i64: 17, 128>}, {pipeline_mode = #tpu.pipeline_mode<synchronous>, transform_indices = @transform_1, window_bounds = array<i64: 16, 18>}, {pipeline_mode = #tpu.pipeline_mode<synchronous>, transform_indices = @transform_2, window_bounds = array<i64: 1, 17>}, {pipeline_mode = #tpu.pipeline_mode<synchronous>, transform_indices = @transform_3, window_bounds = array<i64: 8, 128>}]} {
    %c0 = arith.constant 0 : index
    %c0_0 = arith.constant 0 : index
    %0 = vector.load %arg1[%c0, %c0_0] : memref<17x128xf32, #tpu.memory_space<vmem>>, vector<17x128xf32>
    %c0_1 = arith.constant 0 : index
    %c0_2 = arith.constant 0 : index
    %1 = vector.load %arg2[%c0_1, %c0_2] : memref<16x18xf32, #tpu.memory_space<vmem>>, vector<16x18xf32>
    %c0_3 = arith.constant 0 : index
    %c0_4 = arith.constant 0 : index
    %2 = vector.load %arg3[%c0_3, %c0_4] : memref<1x17xf32, #tpu.memory_space<vmem>>, vector<1x17xf32>
    %3 = vector.extract_strided_slice %1 {offsets = [0, 0], sizes = [16, 17], strides = [1, 1]} : vector<16x18xf32> to vector<16x17xf32>
    %cst = arith.constant dense<0.000000e+00> : vector<16x128xf32>
    %4 = tpu.matmul %3, %0, %cst {dimension_numbers = #tpu.dot_dimension_numbers<[1], [0], [0], [1], [0, 0, 1, 1], [], []>} : vector<16x17xf32>, vector<17x128xf32>, vector<16x128xf32> -> vector<16x128xf32>
    %5 = vector.extract_strided_slice %1 {offsets = [0, 17], sizes = [16, 1], strides = [1, 1]} : vector<16x18xf32> to vector<16x1xf32>
    %6 = vector.broadcast %5 : vector<16x1xf32> to vector<16x128xf32>
    %7 = arith.addf %4, %6 : vector<16x128xf32>
    %cst_5 = arith.constant 0.000000e+00 : f32
    %8 = vector.broadcast %cst_5 : f32 to vector<16x128xf32>
    %9 = arith.maximumf %7, %8 : vector<16x128xf32>
    %10 = vector.extract_strided_slice %2 {offsets = [0, 0], sizes = [1, 16], strides = [1, 1]} : vector<1x17xf32> to vector<1x16xf32>
    %cst_6 = arith.constant dense<0.000000e+00> : vector<1x128xf32>
    %11 = tpu.matmul %10, %9, %cst_6 {dimension_numbers = #tpu.dot_dimension_numbers<[1], [0], [0], [1], [0, 0, 1, 1], [], []>} : vector<1x16xf32>, vector<16x128xf32>, vector<1x128xf32> -> vector<1x128xf32>
    %12 = vector.extract_strided_slice %2 {offsets = [0, 16], sizes = [1, 1], strides = [1, 1]} : vector<1x17xf32> to vector<1x1xf32>
    %13 = vector.broadcast %12 : vector<1x1xf32> to vector<1x128xf32>
    %14 = arith.addf %11, %13 : vector<1x128xf32>
    %c0_7 = arith.constant 0 : index
    %c0_8 = arith.constant 0 : index
    %15 = vector.load %arg4[%c0_7, %c0_8] : memref<8x128xf32, #tpu.memory_space<vmem>>, vector<1x128xf32>
    tpu.vector_store %arg4[%c0_7, %c0_8], %14 {strides = array<i32>} : memref<8x128xf32, #tpu.memory_space<vmem>>, vector<1x128xf32>,
    %16 = arith.negf %14 : vector<1x128xf32>
    %17 = math.exp %16 : vector<1x128xf32>
    %cst_9 = arith.constant 1.000000e+00 : f32
    %18 = vector.broadcast %cst_9 : f32 to vector<1x128xf32>
    %19 = arith.addf %18, %17 : vector<1x128xf32>
    %20 = arith.divf %18, %19 : vector<1x128xf32>
    %c1 = arith.constant 1 : index
    %c0_10 = arith.constant 0 : index
    %21 = vector.load %arg4[%c1, %c0_10] : memref<8x128xf32, #tpu.memory_space<vmem>>, vector<1x128xf32>
    tpu.vector_store %arg4[%c1, %c0_10], %20 {strides = array<i32>} : memref<8x128xf32, #tpu.memory_space<vmem>>, vector<1x128xf32>,
    %cst_11 = arith.constant 0.000000e+00 : f32
    %22 = vector.broadcast %cst_11 : f32 to vector<6x128xf32>
    %c2 = arith.constant 2 : index
    %c0_12 = arith.constant 0 : index
    %23 = vector.load %arg4[%c2, %c0_12] : memref<8x128xf32, #tpu.memory_space<vmem>>, vector<6x128xf32>
    tpu.vector_store %arg4[%c2, %c0_12], %22 {strides = array<i32>} : memref<8x128xf32, #tpu.memory_space<vmem>>, vector<6x128xf32>,
    return
  }
  func.func @transform_0(%arg0: i32) -> (i32, i32) {
    %c0_i32 = arith.constant 0 : i32
    %c0_i32_0 = arith.constant 0 : i32
    %c0_i32_1 = arith.constant 0 : i32
    return %c0_i32, %c0_i32_0 : i32, i32
  }
  func.func @transform_1(%arg0: i32) -> (i32, i32) {
    %c0_i32 = arith.constant 0 : i32
    %c0_i32_0 = arith.constant 0 : i32
    %c0_i32_1 = arith.constant 0 : i32
    return %c0_i32, %c0_i32_0 : i32, i32
  }
  func.func @transform_2(%arg0: i32) -> (i32, i32) {
    %c0_i32 = arith.constant 0 : i32
    %c0_i32_0 = arith.constant 0 : i32
    %c0_i32_1 = arith.constant 0 : i32
    return %c0_i32, %c0_i32_0 : i32, i32
  }
  func.func @transform_3(%arg0: i32) -> (i32, i32) {
    %c0_i32 = arith.constant 0 : i32
    %c0_i32_0 = arith.constant 0 : i32
    %c0_i32_1 = arith.constant 0 : i32
    return %c0_i32, %c0_i32_0 : i32, i32
  }
}

</mosaic_0001>

<bundles_post_ra>
// kernel: squeeze.15
= control target key start
LH: loop header
LB: loop body
LE: loop exit
PB: predicated region body
PF: predicated region fallthrough
CT: control target
= control target key end

     0   :  { %s80_s0 = inlined_call_operand.vmem [shape: f32[32], index: 0, kind: input, shape index: {}]   ;;  %s81_s1 = inlined_call_operand.hbm [shape: f32[2,16,1], index: 1, kind: output, shape index: {}]  }
   0x1   :  { %v5_v0 = vld [vmem:[%s80_s0] sm:$0x1] }
   0x2   :  { %2 = vsyncpa [#allocation1], 0  ;;  %6 = vst [vmem:[#allocation3] sm:$0x1] %v5_v0  ;;  %vm8_vm0 = vcmask 130048   ;;  %s62_s0 = smov 112  }
   0x3   :  { %s63_s8 = smov [#allocation0]   ;;  %s27_s1 = sshll.u32 %s81_s1, 4  ;;  %s28_s1 = int_to_ptr.hbm [resolvable:$true] %s27_s1 }
   0x4   :  { %s25_s9 = sshll.u32 %s63_s8, 4  ;;  %s26_s9 = int_to_ptr.vmem [resolvable:$true] %s25_s9 }
   0x9   :  { %v10_v1 = vld [vmem:[#allocation3] sm:$0x1]  }
   0xa   :  { %v7_v2 = vld [vmem:[#allocation3] sm:$0x1]   ;;  %11 = vrot.lane.b32.xlu0 %v10_v1, %s62_s0 }
   0xb   :  { %9 = vst.msk [vmem:[#allocation2] sm:$0x1] %vm8_vm0, %v7_v2  }
  0x7c   :  { %v12_v3 = vpop.permute.xlu0 %11  }
  0x7d   :  { %15 = vst.msk [vmem:[#allocation2 + $0x1] sm:$0x1] %vm8_vm0, %v12_v3  }
  0x84   :  { %v18_v4 = vld [vmem:[#allocation2] sm:$0x3] }
  0x85   :  { %21 = vst [vmem:[#allocation0] sm:$0x3] %v18_v4 }
  0x86   :  { %30 = dma.vmem_to_hbm [thread:$0]  %s26_s9, 32, %s28_s1, [#allocation1]  }
  0x87   :  { %60 = dma.done.wait [#allocation1], 32  }
  0x88   :  { %61 = vsyncadd [#allocation1], 4294967264 }
  0x89   :  { %33 = vsyncpa [#allocation1], 1 }

// kernel: _forward_jit.2
= control target key start
LH: loop header
LB: loop body
LE: loop exit
PB: predicated region body
PF: predicated region fallthrough
CT: control target
= control target key end

     0   :  { %15 = vsyncpa [#allocation3], 0  ;;  %s3174_s0 = inlined_call_operand.vmem [shape: f32[8,512], index: 0, kind: input, shape index: {}]   ;;  %s3175_s1 = inlined_call_operand.vmem [shape: f32[9,512], index: 1, kind: input, shape index: {}]   ;;  %s3176_s2 = inlined_call_operand.hbm [shape: f32[512,128], index: 2, kind: input, shape index: {}]   ;;  %s3177_s3 = inlined_call_operand.hbm [shape: f32[128,512], index: 3, kind: input, shape index: {}]   ;;  %s3178_s4 = inlined_call_operand.vmem [shape: f32[8,73], index: 4, kind: input, shape index: {}]   ;;  %s3179_s5 = inlined_call_operand.vmem [shape: f32[16,73], index: 5, kind: input, shape index: {}]   ;;  %s3180_s6 = inlined_call_operand.vmem [shape: f32[8,217], index: 6, kind: input, shape index: {}]   ;;  %s3181_s7 = inlined_call_operand.vmem [shape: f32[1,9], index: 7, kind: input, shape index: {}]   ;;  %s3182_s8 = inlined_call_operand.vmem [shape: f32[16,128], index: 8, kind: output, shape index: {0}]   ;;  %s3183_s9 = inlined_call_operand.vmem [shape: f32[8,512], index: 9, kind: output, shape index: {1}]  }
   0x1   :  { %s25_s11 = sshll.u32 %s3176_s2, 4  ;;  %s26_s11 = int_to_ptr.hbm [resolvable:$true] %s25_s11 }
   0x2   :  { %16 = vsyncpa [#allocation5], 0  ;;  %s1726_s12 = smov [#allocation2]   ;;  %s38_s16 = sshll.u32 %s3177_s3, 4  ;;  %s39_s16 = int_to_ptr.hbm [resolvable:$true] %s38_s16 }
   0x3   :  { %s27_s13 = sshll.u32 %s1726_s12, 4  ;;  %s1727_s17 = smov 128   ;;  %s28_s13 = int_to_ptr.vmem [resolvable:$true] %s27_s13 }
   0x4   :  { %s1728_s18 = smov 8   ;;  %s1729_s19 = smov [#allocation4]  }
   0x5   :  { %33 = dma.hbm_to_vmem [thread:$0]  %s26_s11, 8192, %s28_s13, [#allocation3], %s1727_s17, %s1727_s17, %s1728_s18  }
   0x6   :  { %s40_s20 = sshll.u32 %s1729_s19, 4  ;;  %s1730_s21 = smov 512   ;;  %s41_s20 = int_to_ptr.vmem [resolvable:$true] %s40_s20 }
   0x7   :  { %s1731_s22 = smov 32  }
   0x8   :  { %46 = dma.hbm_to_vmem [thread:$0]  %s39_s16, 8192, %s41_s20, [#allocation5], %s1730_s21, %s1730_s21, %s1731_s22  }
   0x9   :  { %1722 = dma.done.wait [#allocation3], 8192  }
   0xa   :  { %1723 = vsyncadd [#allocation3], 4294959104 }
   0xb   :  { %1724 = dma.done.wait [#allocation5], 8192  }
   0xc   :  { %1725 = vsyncadd [#allocation5], 4294959104  ;;  %v1803_v0 = vld [vmem:[%s3174_s0 + $0x18] sm:$0xff]  ;;  %v1808_v1 = vld [vmem:[%s3174_s0 + $0x10] sm:$0xff]  ;;  %s1732_s27 = smov 111   ;;  %s1733_s28 = smov 112   ;;  %v3184_v6 = vlaneseq }
   0xd   :  { %v1813_v2 = vld [vmem:[%s3174_s0] sm:$0xff]  ;;  %230 = vrot.lane.b32.xlu1 %v1803_v0, %s1732_s27  ;;  %207 = vrot.lane.b32.xlu2 %v1808_v1, %s1733_s28  ;;  %s1734_s29 = smov 113   ;;  %s1735_s30 = smov 127   ;;  %v1842_v3 = vld [vmem:[%s3174_s0 + $0x8] sm:$0xff]  ;;  %vm251_vm8 = vcmask 588800   ;;  %vm1157_vm9 = vcmask 719872  }
   0xe   :  { %224 = vrot.lane.b32.xlu0 %v1813_v2, %s1732_s27  ;;  %s1736_s12 = smov 1   ;;  %s1737_s13 = smov 15   ;;  %v1887_v7 = vand.u32 127, %v3184_v6  ;;  %v1893_v9 = vld [vmem:[%s3175_s1 + $0x38] ss:$0 sm:$0xff]  ;;  %v1906_v15 = vld [vmem:[%s3175_s1 + $0x10] sm:$0xff] }
   0xf   :  { %s1738_s0 = smov 16   ;;  %s1739_s14 = smov 17   ;;  %v1901_v14 = vld [vmem:[%s3175_s1 + $0x18] sm:$0xff]  ;;  %v1915_v17 = vld [vmem:[%s3175_s1 + $0x30] ss:$0 sm:$0xff]  ;;  %v1923_v22 = vperm.slane %v1906_v15, 7 }
  0x10   :  { %vm232_vm0 = vcmp.lt.s32.totalorder %v1887_v7, 111  ;;  %v1909_v16 = vperm.slane %v1901_v14, 7  ;;  %vm211_vm1 = vcmp.lt.s32.totalorder %v1887_v7, 112  ;;  %v1934_v28 = vperm.slane %v1906_v15, 6  ;;  %v1975_v47 = vld [vmem:[%s3175_s1 + $0x20] ss:$0 sm:$0xff] }
  0x11   :  { %3247 = vst [vmem:[#allocation8_spill] sm:$0xff] %v1923_v22  ;;  %vm190_vm2 = vcmp.lt.s32.totalorder %v1887_v7, 113  ;;  %v1938_v29 = vperm.slane %v1901_v14, 6  ;;  %v1947_v37 = vperm.slane %v1906_v15, 5  ;;  %vm169_vm3 = vcmp.lt.s32.totalorder %v1887_v7, 127  ;;  %v1998_v57 = vld [vmem:[%s3175_s1] sm:$0xff] }
  0x12   :  { %3248 = vst [vmem:[#allocation9_spill] sm:$0xff] %v1934_v28  ;;  %v1951_v38 = vperm.slane %v1901_v14, 5  ;;  %vm148_vm4 = vcmp.lt.s32.totalorder %v1887_v7, 1  ;;  %v1970_v46 = vperm.slane %v1906_v15, 3  ;;  %v1980_v48 = vld [vmem:[%s3175_s1 + $0x28] ss:$0 sm:$0xff] }
  0x13   :  { %3249 = vst [vmem:[#allocation10_spill] sm:$0xff] %v1938_v29  ;;  %v2003_v58 = vld [vmem:[%s3175_s1 + $0x8] sm:$0xff]  ;;  %v2006_v60 = vperm.slane %v1998_v57, 7  ;;  %v2012_v62 = vperm.slane %v1901_v14, 3  ;;  %vm127_vm5 = vcmp.lt.s32.totalorder %v1887_v7, 15  ;;  %vm106_vm6 = vcmp.lt.s32.totalorder %v1887_v7, 16 }
  0x14   :  { %3250 = vst [vmem:[#allocation11_spill] sm:$0xff] %v1947_v37  ;;  %v2009_v61 = vperm.slane %v2003_v58, 7  ;;  %vm85_vm7 = vcmp.lt.s32.totalorder %v1887_v7, 17  ;;  %vm1331_vm10 = vcmask 64512   ;;  %vm1499_vm11 = vcmask 1040384  }
  0x15   :  { %209 = vrot.lane.b32.xlu2 %v1803_v0, %s1733_s28  ;;  %203 = vrot.lane.b32.xlu1 %v1813_v2, %s1733_s28  ;;  %3251 = vst [vmem:[#allocation12_spill] sm:$0xff] %v1951_v38  ;;  %vm1501_vm12 = vcmask 1042434   ;;  %vm1503_vm13 = vcmask 1041408  }
  0x16   :  { %228 = vrot.lane.b32.xlu0 %v1808_v1, %s1732_s27  ;;  %3252 = vst [vmem:[#allocation13_spill] sm:$0xff] %v1970_v46 }
  0x17   :  { %3253 = vst [vmem:[#allocation14_spill] sm:$0xff] %v2012_v62 }
  0x1d   :  { %188 = vrot.lane.b32.xlu2 %v1803_v0, %s1734_s29  ;;  %186 = vrot.lane.b32.xlu1 %v1808_v1, %s1734_s29 }
  0x1e   :  { %182 = vrot.lane.b32.xlu0 %v1813_v2, %s1734_s29 }
  0x25   :  { %167 = vrot.lane.b32.xlu2 %v1803_v0, %s1735_s30  ;;  %165 = vrot.lane.b32.xlu1 %v1808_v1, %s1735_s30 }
  0x26   :  { %161 = vrot.lane.b32.xlu0 %v1813_v2, %s1735_s30 }
  0x2d   :  { %144 = vrot.lane.b32.xlu2 %v1808_v1, %s1736_s12  ;;  %142 = vrot.lane.b32.xlu1 %v1842_v3, %s1736_s12 }
  0x2e   :  { %226 = vrot.lane.b32.xlu0 %v1842_v3, %s1732_s27 }
  0x35   :  { %121 = vrot.lane.b32.xlu2 %v1842_v3, %s1737_s13  ;;  %205 = vrot.lane.b32.xlu1 %v1842_v3, %s1733_s28 }
  0x36   :  { %146 = vrot.lane.b32.xlu0 %v1803_v0, %s1736_s12 }
  0x3d   :  { %184 = vrot.lane.b32.xlu2 %v1842_v3, %s1734_s29  ;;  %125 = vrot.lane.b32.xlu1 %v1803_v0, %s1737_s13 }
  0x3e   :  { %123 = vrot.lane.b32.xlu0 %v1808_v1, %s1737_s13 }
  0x45   :  { %104 = vrot.lane.b32.xlu2 %v1803_v0, %s1738_s0  ;;  %102 = vrot.lane.b32.xlu1 %v1808_v1, %s1738_s0 }
  0x46   :  { %100 = vrot.lane.b32.xlu0 %v1842_v3, %s1738_s0 }
  0x4d   :  { %79 = vrot.lane.b32.xlu2 %v1808_v1, %s1739_s14  ;;  %77 = vrot.lane.b32.xlu1 %v1842_v3, %s1739_s14 }
  0x4e   :  { %163 = vrot.lane.b32.xlu0 %v1842_v3, %s1735_s30 }
  0x55   :  { %119 = vrot.lane.b32.xlu2 %v1813_v2, %s1737_s13  ;;  %140 = vrot.lane.b32.xlu1 %v1813_v2, %s1736_s12 }
  0x56   :  { %81 = vrot.lane.b32.xlu0 %v1803_v0, %s1739_s14 }
  0x5d   :  { %75 = vrot.lane.b32.xlu1 %v1813_v2, %s1739_s14 }
  0x5e   :  { %98 = vrot.lane.b32.xlu0 %v1813_v2, %s1738_s0 }
  0x67   :  { %v1884_v4 = vpop.permute.xlu2 %207 }
  0x6f   :  { %v210_v5 = vpop.permute.xlu2 %209 }
  0x70   :  { %v212_v23 = vsel %vm211_vm1, %v1884_v4, %v210_v5 }
  0x71   :  { %v222_v27 = vmul.f32 %v1923_v22, %v212_v23 }
  0x77   :  { %v189_v8 = vpop.permute.xlu2 %188 }
  0x7f   :  { %v231_v10 = vpop.permute.xlu1 %230  ;;  %v168_v18 = vpop.permute.xlu2 %167 }
  0x80   :  { %v225_v11 = vpop.permute.xlu0 %224 }
  0x81   :  { %v236_v12 = vsel %vm232_vm0, %v231_v10, %v225_v11 }
  0x82   :  { %v244_v13 = vmul.f32 %v1893_v9, %v236_v12 }
  0x84   :  { %321 = vmatpush.msra.mxu3 %v244_v13 }
  0x87   :  { %v1917_v19 = vpop.permute.xlu1 %203  ;;  %v145_v33 = vpop.permute.xlu2 %144 }
  0x88   :  { %v215_v20 = vsel %vm211_vm1, %v210_v5, %v1917_v19  ;;  %v229_v21 = vpop.permute.xlu0 %228 }
  0x89   :  { %v233_v24 = vsel %vm232_vm0, %v229_v21, %v231_v10  ;;  %v223_v25 = vmul.f32 %v1909_v16, %v215_v20 }
  0x8a   :  { %v243_v26 = vmul.f32 %v1915_v17, %v233_v24  ;;  %v2045_v24 = vperm.slane %v1901_v14, 2 }
  0x8b   :  { %322 = vmatpush.msra.mxu3 %v223_v25 }
  0x8c   :  { %301 = vmatpush.msra.mxu2 %v243_v26  ;;  %3256 = vst [vmem:[#allocation17_spill] sm:$0xff] %v2045_v24 }
  0x8e   :  { %302 = vmatpush.msra.mxu2 %v222_v27 }
  0x8f   :  { %v187_v30 = vpop.permute.xlu1 %186  ;;  %v1965_v45 = vpop.permute.xlu2 %121 }
  0x90   :  { %v191_v31 = vsel %vm190_vm2, %v187_v30, %v189_v8  ;;  %v183_v32 = vpop.permute.xlu0 %182 }
  0x91   :  { %v194_v34 = vsel %vm190_vm2, %v189_v8, %v183_v32  ;;  %v201_v35 = vmul.f32 %v1934_v28, %v191_v31 }
  0x92   :  { %v202_v36 = vmul.f32 %v1938_v29, %v194_v34  ;;  %v2057_v34 = vperm.slane %v1901_v14, 1 }
  0x93   :  { %303 = vmatpush.msra.mxu2 %v201_v35  ;;  %v2061_v35 = vperm.slane %v1906_v15, 1 }
  0x94   :  { %323 = vmatpush.msra.mxu3 %v202_v36  ;;  %3257 = vst [vmem:[#allocation18_spill] sm:$0xff] %v2057_v34 }
  0x95   :  { %3258 = vst [vmem:[#allocation19_spill] sm:$0xff] %v2061_v35 }
  0x97   :  { %v1953_v39 = vpop.permute.xlu1 %165  ;;  %v185_v59 = vpop.permute.xlu2 %184 }
  0x98   :  { %v170_v40 = vsel %vm169_vm3, %v1953_v39, %v168_v18  ;;  %v1958_v41 = vpop.permute.xlu0 %161  ;;  %v192_v5 = vsel %vm190_vm2, %v185_v59, %v187_v30  ;;  %v193_v8 = vsel %vm190_vm2, %v183_v32, %v185_v59 }
  0x99   :  { %v173_v42 = vsel %vm169_vm3, %v168_v18, %v1958_v41  ;;  %v180_v43 = vmul.f32 %v1947_v37, %v170_v40 }
  0x9a   :  { %v181_v44 = vmul.f32 %v1951_v38, %v173_v42 }
  0x9b   :  { %304 = vmatpush.msra.mxu2 %v180_v43  ;;  %v2071_v43 = vld [vmem:[%s3178_s4] sm:$0xff] }
  0x9c   :  { %324 = vmatpush.msra.mxu3 %v181_v44  ;;  %v1740_v44 = vmov 72  }
  0x9d   :  { %305 = vmatpush.msra.mxu2 %v1808_v1  ;;  %v2018_v1 = vperm.slane %v2003_v58, 6  ;;  %1645 = vset.pattern.permute.xlu2 %v1740_v44 }
  0x9e   :  { %325 = vmatpush.msra.mxu3 %v1803_v0  ;;  %v2015_v0 = vperm.slane %v1998_v57, 6  ;;  %1646 = vset.pattern.permute.xlu0 %v1740_v44 }
  0x9f   :  { %v1983_v49 = vpop.permute.xlu1 %142  ;;  %3254 = vst [vmem:[#allocation15_spill] sm:$0xff] %v2018_v1  ;;  %v200_v23 = vmul.f32 %v2018_v1, %v192_v5  ;;  %v2047_v27 = vpop.permute.xlu2 %104  ;;  %248 = vperm.xlu2 %1645, %v2071_v43  }
  0xa0   :  { %v150_v50 = vsel %vm148_vm4, %v1983_v49, %v145_v33  ;;  %v227_v51 = vpop.permute.xlu0 %226 }
  0xa1   :  { %v235_v52 = vsel %vm232_vm0, %v225_v11, %v227_v51  ;;  %v234_v53 = vsel %vm232_vm0, %v227_v51, %v229_v21  ;;  %v159_v54 = vmul.f32 %v1970_v46, %v150_v50 }
  0xa2   :  { %v241_v55 = vmul.f32 %v1975_v47, %v235_v52  ;;  %v242_v56 = vmul.f32 %v1980_v48, %v234_v53 }
  0xa3   :  { %306 = vmatpush.msra.mxu2 %v159_v54  ;;  %v2081_v54 = vperm.slane %v1906_v15, 0 }
  0xa4   :  { %261 = vmatpush.msra.mxu0 %v241_v55  ;;  %281 = vmatpush.msra.mxu1 %v242_v56  ;;  %v2084_v55 = vperm.slane %v1998_v57, 5  ;;  %v2087_v56 = vperm.slane %v2003_v58, 5 }
  0xa5   :  { %3259 = vst [vmem:[#allocation20_spill] sm:$0xff] %v2081_v54 }
  0xa6   :  { %3260 = vst [vmem:[#allocation21_spill] sm:$0xff] %v2087_v56 }
  0xa7   :  { %v206_v63 = vpop.permute.xlu1 %205  ;;  %v80_v53 = vpop.permute.xlu2 %79 }
  0xa8   :  { %v213_v10 = vsel %vm211_vm1, %v206_v63, %v1884_v4  ;;  %v214_v11 = vsel %vm211_vm1, %v1917_v19, %v206_v63  ;;  %v2030_v12 = vpop.permute.xlu0 %146  ;;  %v199_v4 = vmul.f32 %v2015_v0, %v193_v8  ;;  %v2042_v19 = vperm.slane %v1906_v15, 2 }
  0xa9   :  { %v149_v13 = vsel %vm148_vm4, %v145_v33, %v2030_v12  ;;  %v220_v18 = vmul.f32 %v2006_v60, %v214_v11  ;;  %v221_v20 = vmul.f32 %v2009_v61, %v213_v10 }
  0xaa   :  { %v160_v21 = vmul.f32 %v2012_v62, %v149_v13  ;;  %3255 = vst [vmem:[#allocation16_spill] sm:$0xff] %v2042_v19 }
  0xab   :  { %262 = vmatpush.msra.mxu0 %v220_v18  ;;  %282 = vmatpush.msra.mxu1 %v221_v20  ;;  %v2101_v20 = vperm.slane %v1998_v57, 3 }
  0xac   :  { %326 = vmatpush.msra.mxu3 %v160_v21 }
  0xad   :  { %263 = vmatpush.msra.mxu0 %v199_v4  ;;  %283 = vmatpush.msra.mxu1 %v200_v23  ;;  %v2114_v4 = vperm.slane %v1998_v57, 2  ;;  %v2117_v23 = vperm.slane %v2003_v58, 2 }
  0xaf   :  { %v126_v25 = vpop.permute.xlu1 %125  ;;  %v120_v18 = vpop.permute.xlu2 %119 }
  0xb0   :  { %v124_v26 = vpop.permute.xlu0 %123 }
  0xb1   :  { %v128_v30 = vsel %vm127_vm5, %v124_v26, %v126_v25  ;;  %v129_v31 = vsel %vm127_vm5, %v1965_v45, %v124_v26  ;;  %v130_v26 = vsel %vm127_vm5, %v120_v18, %v1965_v45 }
  0xb2   :  { %v138_v32 = vmul.f32 %v2042_v19, %v129_v31  ;;  %v139_v33 = vmul.f32 %v2045_v24, %v128_v30  ;;  %v131_v30 = vsel %vm127_vm5, %v126_v25, %v120_v18 }
  0xb3   :  { %v136_v25 = vmul.f32 %v2114_v4, %v131_v30 }
  0xb4   :  { %307 = vmatpush.msra.mxu2 %v138_v32  ;;  %327 = vmatpush.msra.mxu3 %v139_v33 }
  0xb7   :  { %v103_v36 = vpop.permute.xlu1 %102 }
  0xb8   :  { %v107_v40 = vsel %vm106_vm6, %v103_v36, %v2047_v27  ;;  %v2066_v42 = vpop.permute.xlu0 %100 }
  0xb9   :  { %v108_v50 = vsel %vm106_vm6, %v2066_v42, %v103_v36  ;;  %v118_v51 = vmul.f32 %v2057_v34, %v107_v40  ;;  %v2143_v36 = vperm.slane %v2003_v58, 1 }
  0xba   :  { %v117_v52 = vmul.f32 %v2061_v35, %v108_v50  ;;  %v2146_v50 = vperm.slane %v1998_v57, 0 }
  0xbb   :  { %328 = vmatpush.msra.mxu3 %v118_v51  ;;  %v2149_v51 = vperm.slane %v2003_v58, 0 }
  0xbc   :  { %308 = vmatpush.msra.mxu2 %v117_v52  ;;  %3263 = vst [vmem:[#allocation24_spill] sm:$0xff] %v2146_v50 }
  0xbf   :  { %v78_v59 = vpop.permute.xlu1 %77 }
  0xc0   :  { %v87_v63 = vsel %vm85_vm7, %v78_v59, %v80_v53  ;;  %v164_v5 = vpop.permute.xlu0 %163 }
  0xc1   :  { %v171_v8 = vsel %vm169_vm3, %v164_v5, %v1953_v39  ;;  %v172_v15 = vsel %vm169_vm3, %v1958_v41, %v164_v5  ;;  %v96_v10 = vmul.f32 %v2081_v54, %v87_v63  ;;  %v2104_v39 = vperm.slane %v2003_v58, 3 }
  0xc2   :  { %v178_v11 = vmul.f32 %v2084_v55, %v172_v15  ;;  %v179_v13 = vmul.f32 %v2087_v56, %v171_v8  ;;  %v2111_v41 = vperm.slane %v1901_v14, 0 }
  0xc3   :  { %309 = vmatpush.msra.mxu2 %v96_v10 }
  0xc4   :  { %264 = vmatpush.msra.mxu0 %v178_v11  ;;  %284 = vmatpush.msra.mxu1 %v179_v13  ;;  %3261 = vst [vmem:[#allocation22_spill] sm:$0xff] %v2111_v41 }
  0xc5   :  { %1594 = vmatmul.msk.f32.vlgmr.msra.gmra.mxu2 %vm251_vm8, %v2071_v43 }
  0xc6   :  { %265 = vmatpush.msra.mxu0 %v1813_v2  ;;  %285 = vmatpush.msra.mxu1 %v1842_v3 }
  0xc7   :  { %v141_v21 = vpop.permute.xlu1 %140 }
  0xc8   :  { %v151_v2 = vsel %vm148_vm4, %v141_v21, %v1983_v49  ;;  %v152_v3 = vsel %vm148_vm4, %v2030_v12, %v141_v21  ;;  %v82_v14 = vpop.permute.xlu0 %81  ;;  %v137_v49 = vmul.f32 %v2117_v23, %v130_v26  ;;  %v2140_v12 = vperm.slane %v1998_v57, 1 }
  0xc9   :  { %v86_v31 = vsel %vm85_vm7, %v80_v53, %v82_v14  ;;  %v157_v32 = vmul.f32 %v2101_v20, %v152_v3  ;;  %v158_v33 = vmul.f32 %v2104_v39, %v151_v2 }
  0xca   :  { %v97_v45 = vmul.f32 %v2111_v41, %v86_v31  ;;  %3262 = vst [vmem:[#allocation23_spill] sm:$0xff] %v2140_v12 }
  0xcb   :  { %266 = vmatpush.msra.mxu0 %v157_v32  ;;  %286 = vmatpush.msra.mxu1 %v158_v33 }
  0xcc   :  { %329 = vmatpush.msra.mxu3 %v97_v45 }
  0xcd   :  { %267 = vmatpush.msra.mxu0 %v136_v25  ;;  %287 = vmatpush.msra.mxu1 %v137_v49 }
  0xce   :  { %1595 = vmatmul.msk.f32.vlgmr.msra.gmra.mxu3 %vm251_vm8, %v2071_v43 }
  0xcf   :  { %v76_v40 = vpop.permute.xlu1 %75 }
  0xd0   :  { %v99_v44 = vpop.permute.xlu0 %98  ;;  %v88_v52 = vsel %vm85_vm7, %v76_v40, %v78_v59  ;;  %v89_v53 = vsel %vm85_vm7, %v82_v14, %v76_v40  ;;  %v2240_v14 = vld [vmem:[%s3179_s5] sm:$0xff] }
  0xd1   :  { %v109_v63 = vsel %vm106_vm6, %v99_v44, %v2066_v42  ;;  %v110_v5 = vsel %vm106_vm6, %v2047_v27, %v99_v44  ;;  %v94_v58 = vmul.f32 %v2146_v50, %v89_v53  ;;  %v95_v59 = vmul.f32 %v2149_v51, %v88_v52 }
  0xd2   :  { %v115_v57 = vmul.f32 %v2140_v12, %v110_v5  ;;  %v116_v8 = vmul.f32 %v2143_v36, %v109_v63 }
  0xd4   :  { %268 = vmatpush.msra.mxu0 %v115_v57  ;;  %288 = vmatpush.msra.mxu1 %v116_v8 }
  0xd6   :  { %269 = vmatpush.msra.mxu0 %v94_v58  ;;  %289 = vmatpush.msra.mxu1 %v95_v59 }
  0xd7   :  { %1592 = vmatmul.msk.f32.vlgmr.msra.gmra.mxu0 %vm251_vm8, %v2071_v43  ;;  %1593 = vmatmul.msk.f32.vlgmr.msra.gmra.mxu1 %vm251_vm8, %v2071_v43 }
  0xf9   :  { %v249_v42 = vpop.permute.xlu2 %248 }
 0x148   :  { %v311_v43 = vpop.f32.mrf.mxu2 }
 0x149   :  { %v312_v21 = vadd.f32 %v311_v43, %v249_v42 }
 0x14b   :  { %v2191_v26 = vmax.f32 %v312_v21, 0.0 }
 0x14d   :  { %3264 = vst [vmem:[#allocation25_spill] sm:$0xff] %v2191_v26 }
 0x151   :  { %v331_v30 = vpop.f32.mrf.mxu3 }
 0x152   :  { %v332_v2 = vadd.f32 %v331_v30, %v249_v42 }
 0x154   :  { %v271_v27 = vpop.f32.mrf.mxu0  ;;  %v291_v15 = vpop.f32.mrf.mxu1  ;;  %v2199_v3 = vmax.f32 %v332_v2, 0.0 }
 0x155   :  { %v272_v10 = vadd.f32 %v271_v27, %v249_v42  ;;  %v292_v11 = vadd.f32 %v291_v15, %v249_v42 }
 0x156   :  { %3265 = vst [vmem:[#allocation26_spill] sm:$0xff] %v2199_v3 }
 0x157   :  { %v2169_v13 = vmax.f32 %v272_v10, 0.0  ;;  %v2171_v18 = vmax.f32 %v292_v11, 0.0 }
 0x159   :  { %402 = vrot.lane.b32.xlu2 %v2169_v13, %s1735_s30  ;;  %450 = vrot.lane.b32.xlu1 %v2169_v13, %s1732_s27 }
 0x15a   :  { %388 = vrot.lane.b32.xlu0 %v2171_v18, %s1736_s12 }
 0x161   :  { %434 = vrot.lane.b32.xlu1 %v2169_v13, %s1733_s28  ;;  %452 = vrot.lane.b32.xlu2 %v2171_v18, %s1732_s27 }
 0x162   :  { %372 = vrot.lane.b32.xlu0 %v2171_v18, %s1737_s13 }
 0x169   :  { %418 = vrot.lane.b32.xlu1 %v2169_v13, %s1734_s29  ;;  %340 = vrot.lane.b32.xlu2 %v2171_v18, %s1739_s14 }
 0x16a   :  { %436 = vrot.lane.b32.xlu0 %v2171_v18, %s1733_s28 }
 0x171   :  { %356 = vrot.lane.b32.xlu1 %v2171_v18, %s1738_s0  ;;  %404 = vrot.lane.b32.xlu2 %v2171_v18, %s1735_s30 }
 0x172   :  { %454 = vrot.lane.b32.xlu0 %v2191_v26, %s1732_s27 }
 0x179   :  { %420 = vrot.lane.b32.xlu1 %v2171_v18, %s1734_s29  ;;  %438 = vrot.lane.b32.xlu2 %v2191_v26, %s1733_s28 }
 0x17a   :  { %440 = vrot.lane.b32.xlu0 %v2199_v3, %s1733_s28 }
 0x181   :  { %456 = vrot.lane.b32.xlu1 %v2199_v3, %s1732_s27  ;;  %422 = vrot.lane.b32.xlu2 %v2191_v26, %s1734_s29 }
 0x182   :  { %424 = vrot.lane.b32.xlu0 %v2199_v3, %s1734_s29 }
 0x189   :  { %390 = vrot.lane.b32.xlu1 %v2191_v26, %s1736_s12  ;;  %406 = vrot.lane.b32.xlu2 %v2191_v26, %s1735_s30 }
 0x18a   :  { %408 = vrot.lane.b32.xlu0 %v2199_v3, %s1735_s30 }
 0x191   :  { %374 = vrot.lane.b32.xlu1 %v2191_v26, %s1737_s13  ;;  %392 = vrot.lane.b32.xlu2 %v2199_v3, %s1736_s12 }
 0x192   :  { %376 = vrot.lane.b32.xlu0 %v2199_v3, %s1737_s13 }
 0x199   :  { %360 = vrot.lane.b32.xlu1 %v2199_v3, %s1738_s0  ;;  %358 = vrot.lane.b32.xlu2 %v2191_v26, %s1738_s0 }
 0x19a   :  { %342 = vrot.lane.b32.xlu0 %v2191_v26, %s1739_s14 }
 0x1a1   :  { %386 = vrot.lane.b32.xlu1 %v2169_v13, %s1736_s12  ;;  %370 = vrot.lane.b32.xlu2 %v2169_v13, %s1737_s13 }
 0x1a2   :  { %344 = vrot.lane.b32.xlu0 %v2199_v3, %s1739_s14 }
 0x1a9   :  { %338 = vrot.lane.b32.xlu1 %v2169_v13, %s1739_s14  ;;  %470 = vperm.xlu2 %1645, %v2240_v14  }
 0x1aa   :  { %354 = vrot.lane.b32.xlu0 %v2169_v13, %s1738_s0 }
 0x1b3   :  { %v2247_v31 = vpop.permute.xlu2 %402 }
 0x1bb   :  { %v453_v32 = vpop.permute.xlu2 %452 }
 0x1c3   :  { %v2249_v33 = vpop.permute.xlu2 %340 }
 0x1cb   :  { %v451_v45 = vpop.permute.xlu1 %450  ;;  %v405_v25 = vpop.permute.xlu2 %404 }
 0x1cc   :  { %v460_v49 = vsel %vm232_vm0, %v451_v45, %v453_v32  ;;  %v2253_v40 = vpop.permute.xlu0 %388  ;;  %v412_v30 = vsel %vm169_vm3, %v2247_v31, %v405_v25 }
 0x1cd   :  { %v2256_v44 = vmul.f32 %v1975_v47, %v460_v49 }
 0x1cf   :  { %489 = vmatpush.msrb.mxu0 %v2256_v44 }
 0x1d3   :  { %v435_v52 = vpop.permute.xlu1 %434  ;;  %v439_v63 = vpop.permute.xlu2 %438 }
 0x1d4   :  { %v2259_v53 = vpop.permute.xlu0 %372 }
 0x1db   :  { %v419_v5 = vpop.permute.xlu1 %418  ;;  %v423_v59 = vpop.permute.xlu2 %422 }
 0x1dc   :  { %v437_v57 = vpop.permute.xlu0 %436 }
 0x1dd   :  { %v444_v8 = vsel %vm211_vm1, %v435_v52, %v437_v57  ;;  %v443_v27 = vsel %vm211_vm1, %v437_v57, %v439_v63 }
 0x1de   :  { %v2264_v58 = vmul.f32 %v444_v8, %v2006_v60  ;;  %v2278_v11 = vmul.f32 %v443_v27, %v2009_v61  ;;  %v2299_v27 = vmul.f32 %v412_v30, %v2084_v55 }
 0x1e0   :  { %490 = vmatpush.msrb.mxu0 %v2264_v58 }
 0x1e3   :  { %v2267_v42 = vpop.permute.xlu1 %356  ;;  %v407_v43 = vpop.permute.xlu2 %406 }
 0x1e4   :  { %v455_v47 = vpop.permute.xlu0 %454  ;;  %v411_v2 = vsel %vm169_vm3, %v405_v25, %v407_v43 }
 0x1e5   :  { %v459_v15 = vsel %vm232_vm0, %v453_v32, %v455_v47  ;;  %v2302_v25 = vmul.f32 %v411_v2, %v2087_v56 }
 0x1e6   :  { %v2274_v10 = vmul.f32 %v1980_v48, %v459_v15 }
 0x1e8   :  { %512 = vmatpush.msrb.mxu1 %v2274_v10 }
 0x1ea   :  { %513 = vmatpush.msrb.mxu1 %v2278_v11 }
 0x1eb   :  { %v421_v21 = vpop.permute.xlu1 %420 }
 0x1ec   :  { %v427_v48 = vsel %vm190_vm2, %v421_v21, %v423_v59  ;;  %v428_v32 = vsel %vm190_vm2, %v419_v5, %v421_v21  ;;  %v441_v49 = vpop.permute.xlu0 %440 }
 0x1ed   :  { %v2291_v57 = vmul.f32 %v428_v32, %v2015_v0  ;;  %v2294_v8 = vmul.f32 %v427_v48, %v2018_v1  ;;  %v442_v21 = vsel %vm211_vm1, %v439_v63, %v441_v49  ;;  %v445_v48 = vsel %vm211_vm1, %v441_v49, %v435_v52  ;;  %v393_v52 = vpop.permute.xlu2 %392 }
 0x1ef   :  { %3266 = vst [vmem:[#allocation27_spill] sm:$0xff] %v2294_v8  ;;  %491 = vmatpush.msrb.mxu0 %v2291_v57  ;;  %514 = vmatpush.msrb.mxu1 %v2294_v8 }
 0x1f1   :  { %492 = vmatpush.msrb.mxu0 %v2299_v27  ;;  %515 = vmatpush.msrb.mxu1 %v2302_v25 }
 0x1f3   :  { %v457_v15 = vpop.permute.xlu1 %456  ;;  %493 = vmatpush.msrb.mxu0 %v2169_v13  ;;  %516 = vmatpush.msrb.mxu1 %v2171_v18 }
 0x1f4   :  { %v458_v30 = vsel %vm232_vm0, %v455_v47, %v457_v15  ;;  %v461_v2 = vsel %vm232_vm0, %v457_v15, %v451_v45  ;;  %v425_v32 = vpop.permute.xlu0 %424  ;;  %v2329_v45 = vmul.f32 %v442_v21, %v1923_v22 }
 0x1f5   :  { %v2317_v6 = vmul.f32 %v1915_v17, %v458_v30  ;;  %v2320_v56 = vmul.f32 %v1893_v9, %v461_v2  ;;  %v426_v8 = vsel %vm190_vm2, %v423_v59, %v425_v32  ;;  %v429_v63 = vsel %vm190_vm2, %v425_v32, %v419_v5 }
 0x1f6   :  { %3268 = vst [vmem:[#allocation29_spill] sm:$0xff] %v2329_v45  ;;  %v2332_v17 = vmul.f32 %v445_v48, %v1909_v16  ;;  %v2337_v9 = vmul.f32 %v426_v8, %v1934_v28  ;;  %v2340_v5 = vmul.f32 %v429_v63, %v1938_v29 }
 0x1f7   :  { %3267 = vst [vmem:[#allocation28_spill] sm:$0xff] %v2317_v6  ;;  %535 = vmatpush.msrb.mxu2 %v2317_v6  ;;  %558 = vmatpush.msrb.mxu3 %v2320_v56 }
 0x1f8   :  { %3269 = vst [vmem:[#allocation30_spill] sm:$0xff] %v2332_v17 }
 0x1f9   :  { %536 = vmatpush.msrb.mxu2 %v2329_v45  ;;  %559 = vmatpush.msrb.mxu3 %v2332_v17  ;;  %3270 = vst [vmem:[#allocation31_spill] sm:$0xff] %v2337_v9 }
 0x1fa   :  { %3271 = vst [vmem:[#allocation32_spill] sm:$0xff] %v2340_v5 }
 0x1fb   :  { %v391_v59 = vpop.permute.xlu1 %390  ;;  %537 = vmatpush.msrb.mxu2 %v2337_v9  ;;  %560 = vmatpush.msrb.mxu3 %v2340_v5 }
 0x1fc   :  { %v409_v47 = vpop.permute.xlu0 %408  ;;  %v394_v48 = vsel %vm148_vm4, %v391_v59, %v393_v52  ;;  %v395_v30 = vsel %vm148_vm4, %v2253_v40, %v391_v59 }
 0x1fd   :  { %v410_v49 = vsel %vm169_vm3, %v407_v43, %v409_v47  ;;  %v413_v15 = vsel %vm169_vm3, %v409_v47, %v2247_v31  ;;  %v2365_v31 = vld [vmem:[%s3179_s5 + $0x8] sm:$0xff]  ;;  %v359_v43 = vpop.permute.xlu2 %358  ;;  %v2371_v2 = vmul.f32 %v395_v30, %v1970_v46  ;;  %v2374_v32 = vmul.f32 %v394_v48, %v2012_v62  ;;  %v617_v62 = vld [vmem:[#allocation2 + $0x118] sm:$0xff] }
 0x1fe   :  { %v2350_v21 = vmul.f32 %v410_v49, %v1947_v37  ;;  %v2353_v8 = vmul.f32 %v413_v15, %v1951_v38  ;;  %475 = vperm.xlu0 %1646, %v2365_v31   ;;  %v363_v59 = vsel %vm106_vm6, %v2267_v42, %v359_v43 }
 0x1ff   :  { %3273 = vst [vmem:[#allocation34_spill] sm:$0xff] %v2371_v2  ;;  %v2394_v9 = vmul.f32 %v363_v59, %v2061_v35  ;;  %v629_v59 = vld [vmem:[#allocation2 + $0x178] sm:$0xff] }
 0x200   :  { %3272 = vst [vmem:[#allocation33_spill] sm:$0xff] %v2353_v8  ;;  %538 = vmatpush.msrb.mxu2 %v2350_v21  ;;  %561 = vmatpush.msrb.mxu3 %v2353_v8 }
 0x201   :  { %3274 = vst [vmem:[#allocation35_spill] sm:$0xff] %v2374_v32 }
 0x202   :  { %539 = vmatpush.msrb.mxu2 %v2191_v26  ;;  %562 = vmatpush.msrb.mxu3 %v2199_v3  ;;  %3277 = vst [vmem:[#allocation38_spill] sm:$0xff] %v2394_v9  ;;  %v618_v3 = vld [vmem:[#allocation2 + $0x120] sm:$0xff] }
 0x203   :  { %v375_v63 = vpop.permute.xlu1 %374 }
 0x204   :  { %v379_v47 = vsel %vm127_vm5, %v2259_v53, %v375_v63  ;;  %540 = vmatpush.msrb.mxu2 %v2371_v2  ;;  %563 = vmatpush.msrb.mxu3 %v2374_v32  ;;  %v377_v49 = vpop.permute.xlu0 %376 }
 0x205   :  { %v378_v15 = vsel %vm127_vm5, %v375_v63, %v377_v49  ;;  %v2387_v48 = vmul.f32 %v379_v47, %v2042_v19 }
 0x206   :  { %v2390_v30 = vmul.f32 %v378_v15, %v2045_v24  ;;  %v627_v24 = vld [vmem:[#allocation2 + $0x168] sm:$0xff] }
 0x207   :  { %3275 = vst [vmem:[#allocation36_spill] sm:$0xff] %v2387_v48  ;;  %541 = vmatpush.msrb.mxu2 %v2387_v48 }
 0x208   :  { %3276 = vst [vmem:[#allocation37_spill] sm:$0xff] %v2390_v30  ;;  %564 = vmatpush.msrb.mxu3 %v2390_v30  ;;  %v371_v30 = vpop.permute.xlu2 %370 }
 0x209   :  { %542 = vmatpush.msrb.mxu2 %v2394_v9  ;;  %v380_v6 = vsel %vm127_vm5, %v371_v30, %v2259_v53 }
 0x20b   :  { %v361_v37 = vpop.permute.xlu1 %360 }
 0x20c   :  { %v362_v45 = vsel %vm106_vm6, %v359_v43, %v361_v37  ;;  %v343_v63 = vpop.permute.xlu0 %342  ;;  %v628_v43 = vld [vmem:[#allocation2 + $0x170] sm:$0xff] }
 0x20d   :  { %v347_v47 = vsel %vm85_vm7, %v2249_v33, %v343_v63  ;;  %v2404_v15 = vmul.f32 %v362_v45, %v2057_v34  ;;  %v381_v45 = vsel %vm127_vm5, %v377_v49, %v371_v30 }
 0x20e   :  { %v2407_v28 = vmul.f32 %v347_v47, %v2081_v54  ;;  %v2437_v53 = vmul.f32 %v381_v45, %v2114_v4 }
 0x20f   :  { %3278 = vst [vmem:[#allocation39_spill] sm:$0xff] %v2404_v15  ;;  %565 = vmatpush.msrb.mxu3 %v2404_v15 }
 0x210   :  { %3279 = vst [vmem:[#allocation40_spill] sm:$0xff] %v2407_v28  ;;  %543 = vmatpush.msrb.mxu2 %v2407_v28  ;;  %v626_v28 = vld [vmem:[#allocation2 + $0x160] sm:$0xff] }
 0x211   :  { %1600 = vmatmul.msk.f32.vlgmr.msrb.gmra.mxu2 %vm251_vm8, %v2240_v14 }
 0x212   :  { %692 = vmatpush.msra.mxu2 %v629_v59 }
 0x213   :  { %v387_v32 = vpop.permute.xlu1 %386 }
 0x214   :  { %v396_v47 = vsel %vm148_vm4, %v387_v32, %v2253_v40  ;;  %v397_v15 = vsel %vm148_vm4, %v393_v52, %v387_v32  ;;  %v345_v34 = vpop.permute.xlu0 %344  ;;  %693 = vmatpush.msra.mxu2 %v628_v43  ;;  %v2441_v52 = vmul.f32 %v380_v6, %v2117_v23  ;;  %v625_v32 = vld [vmem:[#allocation2 + $0x158] sm:$0xff] }
 0x215   :  { %v346_v59 = vsel %vm85_vm7, %v343_v63, %v345_v34  ;;  %v2426_v22 = vmul.f32 %v397_v15, %v2101_v20  ;;  %v2429_v49 = vmul.f32 %v396_v47, %v2104_v39  ;;  %v623_v15 = vld [vmem:[#allocation2 + $0x148] sm:$0xff] }
 0x216   :  { %v2432_v40 = vmul.f32 %v346_v59, %v2111_v41  ;;  %694 = vmatpush.msra.mxu2 %v627_v24  ;;  %v624_v24 = vld [vmem:[#allocation2 + $0x150] sm:$0xff]  ;;  %v594_v41 = vld [vmem:[#allocation2 + $0x60] sm:$0xff] }
 0x217   :  { %494 = vmatpush.msrb.mxu0 %v2426_v22  ;;  %517 = vmatpush.msrb.mxu1 %v2429_v49 }
 0x218   :  { %3280 = vst [vmem:[#allocation41_spill] sm:$0xff] %v2432_v40  ;;  %566 = vmatpush.msrb.mxu3 %v2432_v40  ;;  %695 = vmatpush.msra.mxu2 %v626_v28  ;;  %v645_v40 = vld [vmem:[#allocation2 + $0x1f8] sm:$0xff] }
 0x219   :  { %1602 = vmatmul.msk.f32.vlgmr.msrb.gmra.mxu3 %vm251_vm8, %v2240_v14  ;;  %495 = vmatpush.msrb.mxu0 %v2437_v53 }
 0x21a   :  { %518 = vmatpush.msrb.mxu1 %v2441_v52  ;;  %1601 = vmatmul.msk.f32.gmra.mxu2 %vm251_vm8, %v2365_v31 }
 0x21b   :  { %v339_v30 = vpop.permute.xlu1 %338  ;;  %696 = vmatpush.msra.mxu2 %v625_v32  ;;  %v622_v32 = vld [vmem:[#allocation2 + $0x140] sm:$0xff]  ;;  %715 = vmatpush.msra.mxu3 %v645_v40  ;;  %v644_v40 = vld [vmem:[#allocation2 + $0x1f0] sm:$0xff] }
 0x21c   :  { %v355_v63 = vpop.permute.xlu0 %354  ;;  %v348_v6 = vsel %vm85_vm7, %v339_v30, %v2249_v33  ;;  %v349_v28 = vsel %vm85_vm7, %v345_v34, %v339_v30  ;;  %v597_v33 = vld [vmem:[#allocation2 + $0x78] sm:$0xff]  ;;  %v596_v30 = vld [vmem:[#allocation2 + $0x70] sm:$0xff] }
 0x21d   :  { %v364_v43 = vsel %vm106_vm6, %v355_v63, %v2267_v42  ;;  %v365_v45 = vsel %vm106_vm6, %v361_v37, %v355_v63  ;;  %697 = vmatpush.msra.mxu2 %v624_v24  ;;  %v2468_v34 = vmul.f32 %v349_v28, %v2146_v50  ;;  %v2471_v37 = vmul.f32 %v348_v6, %v2149_v51  ;;  %v621_v42 = vld [vmem:[#allocation2 + $0x138] sm:$0xff]  ;;  %v620_v63 = vld [vmem:[#allocation2 + $0x130] sm:$0xff]  ;;  %v595_v28 = vld [vmem:[#allocation2 + $0x68] sm:$0xff] }
 0x21e   :  { %v2460_v47 = vmul.f32 %v365_v45, %v2140_v12  ;;  %v2463_v59 = vmul.f32 %v364_v43, %v2143_v36  ;;  %v613_v24 = vld [vmem:[#allocation2 + $0xf8] sm:$0xff]  ;;  %v612_v6 = vld [vmem:[#allocation2 + $0xf0] sm:$0xff]  ;;  %v619_v43 = vld [vmem:[#allocation2 + $0x128] sm:$0xff]  ;;  %716 = vmatpush.msra.mxu3 %v644_v40 }
 0x21f   :  { %698 = vmatpush.msra.mxu2 %v623_v15  ;;  %3282 = vst [vmem:[#allocation43_spill] sm:$0xff] %v2468_v34  ;;  %v643_v15 = vld [vmem:[#allocation2 + $0x1e8] sm:$0xff]  ;;  %v642_v45 = vld [vmem:[#allocation2 + $0x1e0] sm:$0xff]  ;;  %v592_v40 = vld [vmem:[#allocation2 + $0x50] sm:$0xff] }
 0x220   :  { %3281 = vst [vmem:[#allocation42_spill] sm:$0xff] %v2460_v47  ;;  %496 = vmatpush.msrb.mxu0 %v2460_v47  ;;  %519 = vmatpush.msrb.mxu1 %v2463_v59 }
 0x221   :  { %1603 = vmatmul.msk.f32.gmra.mxu3 %vm251_vm8, %v2365_v31  ;;  %699 = vmatpush.msra.mxu2 %v622_v32  ;;  %v611_v32 = vld [vmem:[#allocation2 + $0xe8] sm:$0xff] }
 0x222   :  { %497 = vmatpush.msrb.mxu0 %v2468_v34  ;;  %520 = vmatpush.msrb.mxu1 %v2471_v37 }
 0x223   :  { %1596 = vmatmul.msk.f32.vlgmr.msrb.gmra.mxu0 %vm251_vm8, %v2240_v14  ;;  %1598 = vmatmul.msk.f32.vlgmr.msrb.gmra.mxu1 %vm251_vm8, %v2240_v14  ;;  %v593_v14 = vld [vmem:[#allocation2 + $0x58] sm:$0xff] }
 0x224   :  { %646 = vmatpush.msra.mxu0 %v597_v33  ;;  %700 = vmatpush.msra.mxu2 %v621_v42  ;;  %v641_v33 = vld [vmem:[#allocation2 + $0x1d8] sm:$0xff]  ;;  %v610_v42 = vld [vmem:[#allocation2 + $0xe0] sm:$0xff] }
 0x225   :  { %669 = vmatpush.msra.mxu1 %v613_v24  ;;  %717 = vmatpush.msra.mxu3 %v643_v15  ;;  %v616_v24 = vld [vmem:[#allocation2 + $0x110] sm:$0xff]  ;;  %v591_v15 = vld [vmem:[#allocation2 + $0x48] sm:$0xff] }
 0x226   :  { %647 = vmatpush.msra.mxu0 %v596_v30  ;;  %701 = vmatpush.msra.mxu2 %v620_v63  ;;  %v640_v30 = vld [vmem:[#allocation2 + $0x1d0] sm:$0xff]  ;;  %v609_v63 = vld [vmem:[#allocation2 + $0xd8] sm:$0xff] }
 0x227   :  { %670 = vmatpush.msra.mxu1 %v612_v6  ;;  %718 = vmatpush.msra.mxu3 %v642_v45  ;;  %v615_v6 = vld [vmem:[#allocation2 + $0x108] sm:$0xff]  ;;  %v638_v45 = vld [vmem:[#allocation2 + $0x1c0] sm:$0xff] }
 0x228   :  { %648 = vmatpush.msra.mxu0 %v595_v28  ;;  %702 = vmatpush.msra.mxu2 %v619_v43  ;;  %v590_v28 = vld [vmem:[#allocation2 + $0x40] sm:$0xff] }
 0x229   :  { %671 = vmatpush.msra.mxu1 %v611_v32  ;;  %719 = vmatpush.msra.mxu3 %v641_v33  ;;  %v614_v43 = vld [vmem:[#allocation2 + $0x100] sm:$0xff]  ;;  %v589_v32 = vld [vmem:[#allocation2 + $0x38] sm:$0xff] }
 0x22a   :  { %649 = vmatpush.msra.mxu0 %v594_v41  ;;  %703 = vmatpush.msra.mxu2 %v618_v3  ;;  %v639_v41 = vld [vmem:[#allocation2 + $0x1c8] sm:$0xff]  ;;  %v608_v3 = vld [vmem:[#allocation2 + $0xd0] sm:$0xff]  ;;  %v637_v33 = vld [vmem:[#allocation2 + $0x1b8] sm:$0xff] }
 0x22b   :  { %1597 = vmatmul.msk.f32.gmra.mxu0 %vm251_vm8, %v2365_v31  ;;  %1599 = vmatmul.msk.f32.gmra.mxu1 %vm251_vm8, %v2365_v31  ;;  %v800_v31 = vld [vmem:[#allocation4 + $0x1f0] sm:$0xff] }
 0x22c   :  { %650 = vmatpush.msra.mxu0 %v593_v14  ;;  %704 = vmatpush.msra.mxu2 %v617_v62  ;;  %v607_v62 = vld [vmem:[#allocation2 + $0xc8] sm:$0xff]  ;;  %v796_v14 = vld [vmem:[#allocation4 + $0x1d0] sm:$0xff] }
 0x22d   :  { %672 = vmatpush.msra.mxu1 %v610_v42  ;;  %720 = vmatpush.msra.mxu3 %v640_v30  ;;  %v588_v42 = vld [vmem:[#allocation2 + $0x30] sm:$0xff] }
 0x22e   :  { %651 = vmatpush.msra.mxu0 %v592_v40  ;;  %705 = vmatpush.msra.mxu2 %v616_v24  ;;  %v792_v40 = vld [vmem:[#allocation4 + $0x1b0] sm:$0xff]  ;;  %v587_v24 = vld [vmem:[#allocation2 + $0x28] sm:$0xff] }
 0x22f   :  { %673 = vmatpush.msra.mxu1 %v609_v63  ;;  %721 = vmatpush.msra.mxu3 %v639_v41  ;;  %v788_v30 = vld [vmem:[#allocation4 + $0x190] sm:$0xff]  ;;  %v586_v63 = vld [vmem:[#allocation2 + $0x20] sm:$0xff] }
 0x230   :  { %652 = vmatpush.msra.mxu0 %v591_v15  ;;  %706 = vmatpush.msra.mxu2 %v615_v6  ;;  %v784_v15 = vld [vmem:[#allocation4 + $0x170] sm:$0xff]  ;;  %v585_v6 = vld [vmem:[#allocation2 + $0x18] sm:$0xff] }
 0x231   :  { %674 = vmatpush.msra.mxu1 %v608_v3  ;;  %722 = vmatpush.msra.mxu3 %v638_v45  ;;  %v780_v41 = vld [vmem:[#allocation4 + $0x150] sm:$0xff]  ;;  %v582_v45 = vld [vmem:[#allocation2] sm:$0xff] }
 0x232   :  { %653 = vmatpush.msra.mxu0 %v590_v28  ;;  %707 = vmatpush.msra.mxu2 %v614_v43  ;;  %v584_v3 = vld [vmem:[#allocation2 + $0x10] sm:$0xff]  ;;  %v583_v43 = vld [vmem:[#allocation2 + $0x8] sm:$0xff] }
 0x233   :  { %675 = vmatpush.msra.mxu1 %v607_v62  ;;  %723 = vmatpush.msra.mxu3 %v637_v33  ;;  %v776_v28 = vld [vmem:[#allocation4 + $0x130] sm:$0xff] }
 0x234   :  { %848 = vmatpush.msrb.mxu2 %v800_v31  ;;  %654 = vmatpush.msra.mxu0 %v589_v32  ;;  %v772_v31 = vld [vmem:[#allocation4 + $0x110] sm:$0xff]  ;;  %v798_v32 = vld [vmem:[#allocation4 + $0x1e0] sm:$0xff] }
 0x235   :  { %v768_v62 = vld [vmem:[#allocation4 + $0xf0] sm:$0xff] }
 0x236   :  { %849 = vmatpush.msrb.mxu2 %v796_v14  ;;  %655 = vmatpush.msra.mxu0 %v588_v42  ;;  %v794_v14 = vld [vmem:[#allocation4 + $0x1c0] sm:$0xff]  ;;  %v764_v33 = vld [vmem:[#allocation4 + $0xd0] sm:$0xff] }
 0x237   :  { %v790_v42 = vld [vmem:[#allocation4 + $0x1a0] sm:$0xff] }
 0x238   :  { %850 = vmatpush.msrb.mxu2 %v792_v40  ;;  %656 = vmatpush.msra.mxu0 %v587_v24  ;;  %v760_v40 = vld [vmem:[#allocation4 + $0xb0] sm:$0xff]  ;;  %v786_v24 = vld [vmem:[#allocation4 + $0x180] sm:$0xff] }
 0x23a   :  { %851 = vmatpush.msrb.mxu2 %v788_v30  ;;  %657 = vmatpush.msra.mxu0 %v586_v63  ;;  %v756_v30 = vld [vmem:[#allocation4 + $0x90] sm:$0xff]  ;;  %v782_v63 = vld [vmem:[#allocation4 + $0x160] sm:$0xff] }
 0x23c   :  { %852 = vmatpush.msrb.mxu2 %v784_v15  ;;  %658 = vmatpush.msra.mxu0 %v585_v6  ;;  %v752_v15 = vld [vmem:[#allocation4 + $0x70] sm:$0xff]  ;;  %v778_v6 = vld [vmem:[#allocation4 + $0x140] sm:$0xff] }
 0x23e   :  { %853 = vmatpush.msrb.mxu2 %v780_v41  ;;  %659 = vmatpush.msra.mxu0 %v584_v3  ;;  %v774_v41 = vld [vmem:[#allocation4 + $0x120] sm:$0xff] }
 0x23f   :  { %v606_v3 = vld [vmem:[#allocation2 + $0xc0] sm:$0xff] }
 0x240   :  { %854 = vmatpush.msrb.mxu2 %v776_v28  ;;  %660 = vmatpush.msra.mxu0 %v583_v43  ;;  %v636_v28 = vld [vmem:[#allocation2 + $0x1b0] sm:$0xff]  ;;  %v770_v43 = vld [vmem:[#allocation4 + $0x100] sm:$0xff] }
 0x241   :  { %676 = vmatpush.msra.mxu1 %v606_v3  ;;  %724 = vmatpush.msra.mxu3 %v636_v28  ;;  %v754_v3 = vld [vmem:[#allocation4 + $0x80] sm:$0xff]  ;;  %v601_v28 = vld [vmem:[#allocation2 + $0x98] sm:$0xff] }
 0x242   :  { %855 = vmatpush.msrb.mxu2 %v772_v31  ;;  %661 = vmatpush.msra.mxu0 %v582_v45  ;;  %v748_v31 = vld [vmem:[#allocation4 + $0x50] sm:$0xff]  ;;  %v605_v45 = vld [vmem:[#allocation2 + $0xb8] sm:$0xff] }
 0x243   :  { %677 = vmatpush.msra.mxu1 %v605_v45  ;;  %v600_v45 = vld [vmem:[#allocation2 + $0x90] sm:$0xff] }
 0x244   :  { %802 = vmatpush.msrb.mxu0 %v798_v32  ;;  %856 = vmatpush.msrb.mxu2 %v768_v62  ;;  %v635_v32 = vld [vmem:[#allocation2 + $0x1a8] sm:$0xff]  ;;  %v766_v62 = vld [vmem:[#allocation4 + $0xe0] sm:$0xff] }
 0x245   :  { %725 = vmatpush.msra.mxu3 %v635_v32  ;;  %v630_v32 = vld [vmem:[#allocation2 + $0x180] sm:$0xff] }
 0x246   :  { %803 = vmatpush.msrb.mxu0 %v794_v14  ;;  %857 = vmatpush.msrb.mxu2 %v764_v33  ;;  %v744_v14 = vld [vmem:[#allocation4 + $0x30] sm:$0xff] }
 0x247   :  { %v604_v33 = vld [vmem:[#allocation2 + $0xb0] sm:$0xff] }
 0x248   :  { %804 = vmatpush.msrb.mxu0 %v790_v42  ;;  %858 = vmatpush.msrb.mxu2 %v760_v40  ;;  %v634_v42 = vld [vmem:[#allocation2 + $0x1a0] sm:$0xff] }
 0x249   :  { %v762_v40 = vld [vmem:[#allocation4 + $0xc0] sm:$0xff]  ;;  %678 = vmatpush.msra.mxu1 %v604_v33  ;;  %726 = vmatpush.msra.mxu3 %v634_v42 }
 0x24a   :  { %805 = vmatpush.msrb.mxu0 %v786_v24  ;;  %859 = vmatpush.msrb.mxu2 %v756_v30  ;;  %v740_v24 = vld [vmem:[#allocation4 + $0x10] sm:$0xff]  ;;  %v603_v30 = vld [vmem:[#allocation2 + $0xa8] sm:$0xff]  ;;  %v742_v33 = vld [vmem:[#allocation4 + $0x20] sm:$0xff] }
 0x24b   :  { %679 = vmatpush.msra.mxu1 %v603_v30  ;;  %v598_v42 = vld [vmem:[#allocation2 + $0x80] sm:$0xff]  ;;  %v801_v30 = vld [vmem:[#allocation4 + $0x1f8] sm:$0xff] }
 0x24c   :  { %806 = vmatpush.msrb.mxu0 %v782_v63  ;;  %860 = vmatpush.msrb.mxu2 %v752_v15  ;;  %v633_v63 = vld [vmem:[#allocation2 + $0x198] sm:$0xff]  ;;  %v758_v15 = vld [vmem:[#allocation4 + $0xa0] sm:$0xff] }
 0x24d   :  { %727 = vmatpush.msra.mxu3 %v633_v63  ;;  %v795_v63 = vld [vmem:[#allocation4 + $0x1c8] sm:$0xff] }
 0x24e   :  { %807 = vmatpush.msrb.mxu0 %v778_v6  ;;  %861 = vmatpush.msrb.mxu2 %v748_v31  ;;  %v602_v6 = vld [vmem:[#allocation2 + $0xa0] sm:$0xff] }
 0x24f   :  { %680 = vmatpush.msra.mxu1 %v602_v6  ;;  %v750_v31 = vld [vmem:[#allocation4 + $0x60] sm:$0xff]  ;;  %v791_v6 = vld [vmem:[#allocation4 + $0x1a8] sm:$0xff] }
 0x250   :  { %808 = vmatpush.msrb.mxu0 %v774_v41  ;;  %862 = vmatpush.msrb.mxu2 %v744_v14  ;;  %v632_v41 = vld [vmem:[#allocation2 + $0x190] sm:$0xff]  ;;  %v599_v14 = vld [vmem:[#allocation2 + $0x88] sm:$0xff] }
 0x251   :  { %728 = vmatpush.msra.mxu3 %v632_v41  ;;  %681 = vmatpush.msra.mxu1 %v601_v28  ;;  %v793_v41 = vld [vmem:[#allocation4 + $0x1b8] sm:$0xff] }
 0x252   :  { %809 = vmatpush.msrb.mxu0 %v770_v43  ;;  %863 = vmatpush.msrb.mxu2 %v740_v24  ;;  %v631_v43 = vld [vmem:[#allocation2 + $0x188] sm:$0xff]  ;;  %v789_v28 = vld [vmem:[#allocation4 + $0x198] sm:$0xff] }
 0x253   :  { %729 = vmatpush.msra.mxu3 %v631_v43  ;;  %682 = vmatpush.msra.mxu1 %v600_v45  ;;  %v799_v24 = vld [vmem:[#allocation4 + $0x1e8] sm:$0xff]  ;;  %v471_v45 = vpop.permute.xlu2 %470 }
 0x254   :  { %810 = vmatpush.msrb.mxu0 %v766_v62  ;;  %v746_v62 = vld [vmem:[#allocation4 + $0x40] sm:$0xff]  ;;  %v783_v43 = vld [vmem:[#allocation4 + $0x168] sm:$0xff] }
 0x255   :  { %730 = vmatpush.msra.mxu3 %v630_v32  ;;  %683 = vmatpush.msra.mxu1 %v599_v14  ;;  %v779_v14 = vld [vmem:[#allocation4 + $0x148] sm:$0xff] }
 0x256   :  { %811 = vmatpush.msrb.mxu0 %v762_v40  ;;  %v738_v40 = vld [vmem:[#allocation4] sm:$0xff] }
 0x257   :  { %684 = vmatpush.msra.mxu1 %v598_v42  ;;  %871 = vmatpush.msrb.mxu3 %v801_v30  ;;  %v771_v30 = vld [vmem:[#allocation4 + $0x108] sm:$0xff] }
 0x258   :  { %812 = vmatpush.msrb.mxu0 %v758_v15  ;;  %v797_v15 = vld [vmem:[#allocation4 + $0x1d8] sm:$0xff] }
 0x259   :  { %825 = vmatpush.msrb.mxu1 %v799_v24  ;;  %872 = vmatpush.msrb.mxu3 %v797_v15  ;;  %v777_v24 = vld [vmem:[#allocation4 + $0x138] sm:$0xff] }
 0x25a   :  { %813 = vmatpush.msrb.mxu0 %v754_v3  ;;  %v787_v3 = vld [vmem:[#allocation4 + $0x188] sm:$0xff] }
 0x25b   :  { %826 = vmatpush.msrb.mxu1 %v795_v63  ;;  %873 = vmatpush.msrb.mxu3 %v793_v41  ;;  %v773_v63 = vld [vmem:[#allocation4 + $0x118] sm:$0xff] }
 0x25c   :  { %814 = vmatpush.msrb.mxu0 %v750_v31  ;;  %v785_v31 = vld [vmem:[#allocation4 + $0x178] sm:$0xff] }
 0x25d   :  { %827 = vmatpush.msrb.mxu1 %v791_v6  ;;  %874 = vmatpush.msrb.mxu3 %v789_v28  ;;  %v767_v6 = vld [vmem:[#allocation4 + $0xe8] sm:$0xff] }
 0x25e   :  { %815 = vmatpush.msrb.mxu0 %v746_v62 }
 0x25f   :  { %828 = vmatpush.msrb.mxu1 %v787_v3  ;;  %875 = vmatpush.msrb.mxu3 %v785_v31  ;;  %v769_v3 = vld [vmem:[#allocation4 + $0xf8] sm:$0xff] }
 0x260   :  { %816 = vmatpush.msrb.mxu0 %v742_v33  ;;  %v781_v33 = vld [vmem:[#allocation4 + $0x158] sm:$0xff] }
 0x261   :  { %829 = vmatpush.msrb.mxu1 %v783_v43  ;;  %876 = vmatpush.msrb.mxu3 %v781_v33 }
 0x262   :  { %817 = vmatpush.msrb.mxu0 %v738_v40  ;;  %v775_v40 = vld [vmem:[#allocation4 + $0x128] sm:$0xff] }
 0x263   :  { %830 = vmatpush.msrb.mxu1 %v779_v14  ;;  %877 = vmatpush.msrb.mxu3 %v777_v24 }
 0x265   :  { %831 = vmatpush.msrb.mxu1 %v775_v40  ;;  %878 = vmatpush.msrb.mxu3 %v773_v63 }
 0x267   :  { %832 = vmatpush.msrb.mxu1 %v771_v30  ;;  %879 = vmatpush.msrb.mxu3 %v769_v3 }
 0x269   :  { %833 = vmatpush.msrb.mxu1 %v767_v6 }
 0x270   :  { %v476_v15 = vpop.permute.xlu0 %475 }
 0x294   :  { %v545_v32 = vpop.f32.mrf.mxu2 }
 0x295   :  { %v546_v62 = vadd.f32 %v545_v32, %v471_v45 }
 0x297   :  { %v576_v42 = vmax.f32 %v546_v62, 0.0 }
 0x299   :  { %708 = vmatmul.f32.vlgmr.msra.gmra.mxu2 %v576_v42 }
 0x29a   :  { %1200 = vmatpush.msra.mxu2 %v2302_v25 }
 0x29c   :  { %v568_v41 = vpop.f32.mrf.mxu3 }
 0x29d   :  { %v569_v28 = vadd.f32 %v568_v41, %v471_v45  ;;  %v548_v43 = vpop.f32.mrf.mxu2 }
 0x29e   :  { %v549_v31 = vadd.f32 %v548_v43, %v476_v15 }
 0x29f   :  { %v577_v32 = vmax.f32 %v569_v28, 0.0 }
 0x2a0   :  { %v499_v62 = vpop.f32.mrf.mxu0  ;;  %v522_v14 = vpop.f32.mrf.mxu1  ;;  %v580_v33 = vmax.f32 %v549_v31, 0.0 }
 0x2a1   :  { %v500_v42 = vadd.f32 %v499_v62, %v471_v45  ;;  %v523_v25 = vadd.f32 %v522_v14, %v471_v45  ;;  %731 = vmatmul.f32.vlgmr.msra.gmra.mxu3 %v577_v32  ;;  %v763_v45 = vld [vmem:[#allocation4 + $0xc8] sm:$0xff]  ;;  %v765_v32 = vld [vmem:[#allocation4 + $0xd8] sm:$0xff] }
 0x2a2   :  { %711 = vmatmul.f32.gmra.mxu2 %v580_v33  ;;  %v759_v62 = vld [vmem:[#allocation4 + $0xa8] sm:$0xff]  ;;  %834 = vmatpush.msrb.mxu1 %v763_v45  ;;  %v761_v14 = vld [vmem:[#allocation4 + $0xb8] sm:$0xff] }
 0x2a3   :  { %v574_v40 = vmax.f32 %v500_v42, 0.0  ;;  %v575_v24 = vmax.f32 %v523_v25, 0.0  ;;  %880 = vmatpush.msrb.mxu3 %v765_v32  ;;  %v755_v33 = vld [vmem:[#allocation4 + $0x88] sm:$0xff]  ;;  %v753_v42 = vld [vmem:[#allocation4 + $0x78] sm:$0xff] }
 0x2a4   :  { %v571_v9 = vpop.f32.mrf.mxu3  ;;  %835 = vmatpush.msrb.mxu1 %v759_v62  ;;  %v749_v25 = vld [vmem:[#allocation4 + $0x58] sm:$0xff] }
 0x2a5   :  { %662 = vmatmul.f32.vlgmr.msra.gmra.mxu0 %v574_v40  ;;  %685 = vmatmul.f32.vlgmr.msra.gmra.mxu1 %v575_v24  ;;  %v572_v30 = vadd.f32 %v571_v9, %v476_v15  ;;  %v757_v9 = vld [vmem:[#allocation4 + $0x98] sm:$0xff]  ;;  %v743_v40 = vld [vmem:[#allocation4 + $0x28] sm:$0xff] }
 0x2a6   :  { %1160 = vmatpush.msra.mxu0 %v2299_v27  ;;  %881 = vmatpush.msrb.mxu3 %v761_v14  ;;  %v751_v27 = vld [vmem:[#allocation4 + $0x68] sm:$0xff]  ;;  %v745_v24 = vld [vmem:[#allocation4 + $0x38] sm:$0xff] }
 0x2a7   :  { %v581_v63 = vmax.f32 %v572_v30, 0.0  ;;  %836 = vmatpush.msrb.mxu1 %v755_v33  ;;  %v739_v30 = vld [vmem:[#allocation4 + $0x8] sm:$0xff] }
 0x2a8   :  { %v502_v41 = vpop.f32.mrf.mxu0  ;;  %v525_v6 = vpop.f32.mrf.mxu1  ;;  %882 = vmatpush.msrb.mxu3 %v757_v9 }
 0x2a9   :  { %v503_v28 = vadd.f32 %v502_v41, %v476_v15  ;;  %v526_v3 = vadd.f32 %v525_v6, %v476_v15  ;;  %734 = vmatmul.f32.gmra.mxu3 %v581_v63  ;;  %837 = vmatpush.msrb.mxu1 %v751_v27  ;;  %v747_v15 = vld [vmem:[#allocation4 + $0x48] sm:$0xff]  ;;  %v741_v63 = vld [vmem:[#allocation4 + $0x18] sm:$0xff] }
 0x2aa   :  { %883 = vmatpush.msrb.mxu3 %v753_v42 }
 0x2ab   :  { %v578_v43 = vmax.f32 %v503_v28, 0.0  ;;  %v579_v31 = vmax.f32 %v526_v3, 0.0  ;;  %838 = vmatpush.msrb.mxu1 %v747_v15 }
 0x2ac   :  { %884 = vmatpush.msrb.mxu3 %v749_v25 }
 0x2ad   :  { %665 = vmatmul.f32.gmra.mxu0 %v578_v43  ;;  %688 = vmatmul.f32.gmra.mxu1 %v579_v31 }
 0x2ae   :  { %839 = vmatpush.msrb.mxu1 %v743_v40  ;;  %885 = vmatpush.msrb.mxu3 %v745_v24 }
 0x2b0   :  { %840 = vmatpush.msrb.mxu1 %v739_v30  ;;  %886 = vmatpush.msrb.mxu3 %v741_v63 }
 0x31c   :  { %v709_v41 = vpop.f32.mrf.mxu2 }
 0x322   :  { %v663_v6 = vpop.f32.mrf.mxu0  ;;  %v686_v28 = vpop.f32.mrf.mxu1 }
 0x323   :  { %v687_v3 = vadd.f32 %v686_v28, %v663_v6 }
 0x324   :  { %v732_v43 = vpop.f32.mrf.mxu3 }
 0x325   :  { %v710_v31 = vadd.f32 %v709_v41, %v687_v3  ;;  %v712_v32 = vpop.f32.mrf.mxu2 }
 0x327   :  { %v733_v45 = vadd.f32 %v732_v43, %v710_v31 }
 0x329   :  { %1490 = vst [vmem:[%s3182_s8] sm:$0xff] %v733_v45  ;;  %818 = vmatmul.f32.vlgmr.msrb.gmra.mxu0 %v733_v45  ;;  %841 = vmatmul.f32.vlgmr.msrb.gmra.mxu1 %v733_v45 }
 0x32a   :  { %864 = vmatmul.f32.vlgmr.msrb.gmra.mxu2 %v733_v45  ;;  %887 = vmatmul.f32.vlgmr.msrb.gmra.mxu3 %v733_v45  ;;  %v666_v62 = vpop.f32.mrf.mxu0  ;;  %v689_v14 = vpop.f32.mrf.mxu1 }
 0x32b   :  { %v690_v33 = vadd.f32 %v689_v14, %v666_v62 }
 0x32c   :  { %v735_v9 = vpop.f32.mrf.mxu3 }
 0x32d   :  { %v713_v27 = vadd.f32 %v712_v32, %v690_v33 }
 0x32f   :  { %v736_v42 = vadd.f32 %v735_v9, %v713_v27 }
 0x331   :  { %1491 = vst [vmem:[%s3182_s8 + $0x8] sm:$0xff] %v736_v42  ;;  %821 = vmatmul.f32.gmra.mxu0 %v736_v42  ;;  %844 = vmatmul.f32.gmra.mxu1 %v736_v42 }
 0x332   :  { %867 = vmatmul.f32.gmra.mxu2 %v736_v42  ;;  %890 = vmatmul.f32.gmra.mxu3 %v736_v42 }
 0x3a6   :  { %v819_v15 = vpop.f32.mrf.mxu0  ;;  %v842_v25 = vpop.f32.mrf.mxu1 }
 0x3a7   :  { %1090 = vrot.lane.b32.xlu0 %v842_v25, %s1733_s28  ;;  %994 = vrot.lane.b32.xlu2 %v842_v25, %s1736_s12 }
 0x3a8   :  { %990 = vrot.lane.b32.xlu1 %v819_v15, %s1736_s12 }
 0x3ad   :  { %v2510_v30 = vpop.f32.mrf.mxu3 }
 0x3ae   :  { %v822_v40 = vpop.f32.mrf.mxu0  ;;  %v2496_v24 = vpop.f32.mrf.mxu1  ;;  %3283 = vst [vmem:[#allocation44_spill] sm:$0xff] %v2510_v30 }
 0x3af   :  { %898 = vrot.lane.b32.xlu0 %v842_v25, %s1739_s14  ;;  %962 = vrot.lane.b32.xlu2 %v842_v25, %s1737_s13 }
 0x3b0   :  { %958 = vrot.lane.b32.xlu1 %v819_v15, %s1737_s13  ;;  %1161 = vmatpush.msra.mxu0 %v822_v40 }
 0x3b1   :  { %1201 = vmatpush.msra.mxu2 %v2496_v24 }
 0x3b2   :  { %1162 = vmatpush.msra.mxu0 %v819_v15 }
 0x3b3   :  { %1202 = vmatpush.msra.mxu2 %v842_v25 }
 0x3b4   :  { %1163 = vmatpush.msra.mxu0 %v2169_v13  ;;  %v2516_v13 = vpop.f32.mrf.mxu2 }
 0x3b5   :  { %1203 = vmatpush.msra.mxu2 %v2171_v18  ;;  %v2568_v6 = vpop.f32.mrf.mxu3 }
 0x3b6   :  { %3284 = vst [vmem:[#allocation45_spill] sm:$0xff] %v2568_v6 }
 0x3b7   :  { %1122 = vrot.lane.b32.xlu2 %v842_v25, %s1732_s27  ;;  %1054 = vrot.lane.b32.xlu0 %v819_v15, %s1734_s29 }
 0x3b8   :  { %1118 = vrot.lane.b32.xlu1 %v819_v15, %s1732_s27 }
 0x3bc   :  { %v2579_v31 = vpop.f32.mrf.mxu2 }
 0x3bf   :  { %930 = vrot.lane.b32.xlu2 %v842_v25, %s1738_s0  ;;  %1026 = vrot.lane.b32.xlu0 %v842_v25, %s1735_s30 }
 0x3c0   :  { %926 = vrot.lane.b32.xlu1 %v819_v15, %s1738_s0 }
 0x3c7   :  { %1002 = vrot.lane.b32.xlu0 %v2510_v30, %s1736_s12  ;;  %1086 = vrot.lane.b32.xlu2 %v819_v15, %s1733_s28 }
 0x3c8   :  { %1058 = vrot.lane.b32.xlu1 %v842_v25, %s1734_s29 }
 0x3cf   :  { %1126 = vrot.lane.b32.xlu0 %v2516_v13, %s1732_s27  ;;  %894 = vrot.lane.b32.xlu2 %v819_v15, %s1739_s14 }
 0x3d0   :  { %970 = vrot.lane.b32.xlu1 %v2510_v30, %s1737_s13 }
 0x3d7   :  { %1130 = vrot.lane.b32.xlu0 %v2510_v30, %s1732_s27  ;;  %1022 = vrot.lane.b32.xlu2 %v819_v15, %s1735_s30 }
 0x3d8   :  { %1094 = vrot.lane.b32.xlu1 %v2516_v13, %s1733_s28 }
 0x3df   :  { %998 = vrot.lane.b32.xlu0 %v2516_v13, %s1736_s12  ;;  %938 = vrot.lane.b32.xlu2 %v2510_v30, %s1738_s0 }
 0x3e0   :  { %1098 = vrot.lane.b32.xlu1 %v2510_v30, %s1733_s28 }
 0x3e7   :  { %1066 = vrot.lane.b32.xlu0 %v2510_v30, %s1734_s29  ;;  %1062 = vrot.lane.b32.xlu2 %v2516_v13, %s1734_s29 }
 0x3e8   :  { %966 = vrot.lane.b32.xlu1 %v2516_v13, %s1737_s13 }
 0x3ef   :  { %996 = vrot.lane.b32.xlu2 %v2496_v24, %s1736_s12  ;;  %1120 = vrot.lane.b32.xlu0 %v822_v40, %s1732_s27 }
 0x3f0   :  { %906 = vrot.lane.b32.xlu1 %v2510_v30, %s1739_s14 }
 0x3f7   :  { %964 = vrot.lane.b32.xlu2 %v2496_v24, %s1737_s13  ;;  %932 = vrot.lane.b32.xlu0 %v2496_v24, %s1738_s0 }
 0x3f8   :  { %934 = vrot.lane.b32.xlu1 %v2516_v13, %s1738_s0 }
 0x3ff   :  { %928 = vrot.lane.b32.xlu2 %v822_v40, %s1738_s0  ;;  %896 = vrot.lane.b32.xlu0 %v822_v40, %s1739_s14 }
 0x400   :  { %1030 = vrot.lane.b32.xlu1 %v2516_v13, %s1735_s30 }
 0x401   :  { %v2555_v18 = vpop.permute.xlu2 %994 }
 0x407   :  { %1092 = vrot.lane.b32.xlu2 %v2496_v24, %s1733_s28  ;;  %1060 = vrot.lane.b32.xlu0 %v2496_v24, %s1734_s29 }
 0x408   :  { %992 = vrot.lane.b32.xlu1 %v822_v40, %s1736_s12 }
 0x409   :  { %v2562_v63 = vpop.permute.xlu2 %962 }
 0x40f   :  { %1056 = vrot.lane.b32.xlu2 %v822_v40, %s1734_s29  ;;  %1028 = vrot.lane.b32.xlu0 %v2496_v24, %s1735_s30 }
 0x410   :  { %960 = vrot.lane.b32.xlu1 %v822_v40, %s1737_s13 }
 0x411   :  { %v1123_v41 = vpop.permute.xlu2 %1122 }
 0x417   :  { %1024 = vrot.lane.b32.xlu2 %v822_v40, %s1735_s30  ;;  %1004 = vrot.lane.b32.xlu0 %v2568_v6, %s1736_s12 }
 0x418   :  { %1124 = vrot.lane.b32.xlu1 %v2496_v24, %s1732_s27 }
 0x419   :  { %v1091_v28 = vpop.permute.xlu0 %1090  ;;  %v2575_v3 = vpop.permute.xlu2 %930 }
 0x41a   :  { %3285 = vst [vmem:[#allocation46_spill] sm:$0xff] %v2575_v3  ;;  %v2577_v43 = vpop.permute.xlu1 %990 }
 0x41f   :  { %1128 = vrot.lane.b32.xlu2 %v2579_v31, %s1732_s27  ;;  %972 = vrot.lane.b32.xlu0 %v2568_v6, %s1737_s13 }
 0x420   :  { %1088 = vrot.lane.b32.xlu1 %v822_v40, %s1733_s28 }
 0x421   :  { %v2586_v45 = vpop.permute.xlu0 %898  ;;  %v1087_v32 = vpop.permute.xlu2 %1086 }
 0x422   :  { %v2590_v62 = vsel %vm211_vm1, %v1087_v32, %v1091_v28  ;;  %v2592_v14 = vpop.permute.xlu1 %958 }
 0x427   :  { %1000 = vrot.lane.b32.xlu2 %v2579_v31, %s1736_s12  ;;  %1096 = vrot.lane.b32.xlu0 %v2579_v31, %s1733_s28 }
 0x428   :  { %900 = vrot.lane.b32.xlu1 %v2496_v24, %s1739_s14 }
 0x429   :  { %v1055_v33 = vpop.permute.xlu0 %1054  ;;  %v2600_v9 = vpop.permute.xlu2 %894 }
 0x42a   :  { %v1119_v27 = vpop.permute.xlu1 %1118 }
 0x42b   :  { %v2604_v42 = vsel %vm232_vm0, %v1119_v27, %v1123_v41 }
 0x42f   :  { %1100 = vrot.lane.b32.xlu2 %v2568_v6, %s1733_s28  ;;  %968 = vrot.lane.b32.xlu0 %v2579_v31, %s1737_s13 }
 0x430   :  { %1132 = vrot.lane.b32.xlu1 %v2568_v6, %s1732_s27 }
 0x431   :  { %v2612_v15 = vpop.permute.xlu0 %1026  ;;  %v2614_v25 = vpop.permute.xlu2 %1022 }
 0x432   :  { %v2616_v40 = vpop.permute.xlu1 %926 }
 0x437   :  { %908 = vrot.lane.b32.xlu2 %v2568_v6, %s1739_s14  ;;  %1068 = vrot.lane.b32.xlu0 %v2568_v6, %s1734_s29 }
 0x438   :  { %940 = vrot.lane.b32.xlu1 %v2568_v6, %s1738_s0 }
 0x439   :  { %v1003_v24 = vpop.permute.xlu0 %1002  ;;  %v939_v54 = vpop.permute.xlu2 %938 }
 0x43a   :  { %v2627_v8 = vsel %vm148_vm4, %v1003_v24, %v2577_v43  ;;  %v2632_v34 = vsel %vm106_vm6, %v939_v54, %v2616_v40  ;;  %v1059_v48 = vpop.permute.xlu1 %1058 }
 0x43b   :  { %3286 = vst [vmem:[#allocation47_spill] sm:$0xff] %v2632_v34  ;;  %v2636_v35 = vsel %vm190_vm2, %v1055_v33, %v1059_v48 }
 0x43f   :  { %936 = vrot.lane.b32.xlu2 %v2579_v31, %s1738_s0  ;;  %904 = vrot.lane.b32.xlu0 %v2579_v31, %s1739_s14 }
 0x440   :  { %1064 = vrot.lane.b32.xlu1 %v2579_v31, %s1734_s29 }
 0x441   :  { %v1127_v5 = vpop.permute.xlu0 %1126  ;;  %v1063_v38 = vpop.permute.xlu2 %1062 }
 0x442   :  { %v2646_v47 = vsel %vm232_vm0, %v1123_v41, %v1127_v5  ;;  %v2650_v1 = vsel %vm190_vm2, %v1059_v48, %v1063_v38  ;;  %v971_v50 = vpop.permute.xlu1 %970 }
 0x443   :  { %3287 = vst [vmem:[#allocation48_spill] sm:$0xff] %v2650_v1  ;;  %v2655_v2 = vsel %vm127_vm5, %v971_v50, %v2592_v14 }
 0x447   :  { %1036 = vrot.lane.b32.xlu2 %v2568_v6, %s1735_s30 }
 0x448   :  { %1032 = vrot.lane.b32.xlu1 %v2579_v31, %s1735_s30 }
 0x449   :  { %v1131_v19 = vpop.permute.xlu0 %1130  ;;  %v2661_v17 = vpop.permute.xlu2 %996 }
 0x44a   :  { %v2665_v41 = vsel %vm232_vm0, %v1127_v5, %v1131_v19  ;;  %v2669_v48 = vsel %vm232_vm0, %v1131_v19, %v1119_v27  ;;  %v1095_v1 = vpop.permute.xlu1 %1094 }
 0x44b   :  { %3288 = vst [vmem:[#allocation49_spill] sm:$0xff] %v2665_v41  ;;  %v2673_v29 = vsel %vm211_vm1, %v1091_v28, %v1095_v1 }
 0x44f   :  { %902 = vrot.lane.b32.xlu2 %v2516_v13, %s1739_s14 }
 0x450   :  { %1034 = vrot.lane.b32.xlu1 %v2510_v30, %s1735_s30 }
 0x451   :  { %v2679_v6 = vpop.permute.xlu0 %998  ;;  %v2681_v34 = vpop.permute.xlu2 %964 }
 0x452   :  { %v2686_v19 = vsel %vm148_vm4, %v2679_v6, %v1003_v24  ;;  %v1099_v5 = vpop.permute.xlu1 %1098 }
 0x453   :  { %3289 = vst [vmem:[#allocation50_spill] sm:$0xff] %v2686_v19  ;;  %v2690_v28 = vsel %vm211_vm1, %v1095_v1, %v1099_v5  ;;  %v2694_v27 = vsel %vm211_vm1, %v1099_v5, %v1087_v32 }
 0x454   :  { %3290 = vst [vmem:[#allocation51_spill] sm:$0xff] %v2690_v28 }
 0x455   :  { %3291 = vst [vmem:[#allocation52_spill] sm:$0xff] %v2694_v27 }
 0x459   :  { %v1067_v41 = vpop.permute.xlu0 %1066  ;;  %v2696_v30 = vpop.permute.xlu2 %928 }
 0x45a   :  { %v2700_v12 = vsel %vm190_vm2, %v1063_v38, %v1067_v41  ;;  %v2704_v24 = vsel %vm190_vm2, %v1067_v41, %v1055_v33  ;;  %v2706_v19 = vpop.permute.xlu1 %966 }
 0x45b   :  { %3292 = vst [vmem:[#allocation53_spill] sm:$0xff] %v2700_v12  ;;  %v2711_v1 = vsel %vm127_vm5, %v2706_v19, %v971_v50 }
 0x45c   :  { %3293 = vst [vmem:[#allocation54_spill] sm:$0xff] %v2704_v24 }
 0x45d   :  { %3294 = vst [vmem:[#allocation55_spill] sm:$0xff] %v2706_v19  ;;  %v1010_v19 = vsel %vm148_vm4, %v2577_v43, %v2555_v18  ;;  %v978_v43 = vsel %vm127_vm5, %v2592_v14, %v2562_v63  ;;  %v946_v14 = vsel %vm106_vm6, %v2616_v40, %v2575_v3 }
 0x45e   :  { %3295 = vst [vmem:[#allocation56_spill] sm:$0xff] %v2711_v1  ;;  %v951_v3 = vmul.f32 %v946_v14, %v2143_v36 }
 0x461   :  { %v2713_v32 = vpop.permute.xlu2 %1092  ;;  %v2715_v5 = vpop.permute.xlu0 %1120 }
 0x462   :  { %v2717_v28 = vpop.permute.xlu1 %906 }
 0x463   :  { %3296 = vst [vmem:[#allocation57_spill] sm:$0xff] %v2717_v28 }
 0x469   :  { %v2719_v27 = vpop.permute.xlu0 %932  ;;  %v2723_v12 = vpop.permute.xlu2 %1056 }
 0x46a   :  { %v2721_v38 = vpop.permute.xlu1 %934 }
 0x46b   :  { %3297 = vst [vmem:[#allocation58_spill] sm:$0xff] %v2721_v38  ;;  %v2728_v33 = vsel %vm106_vm6, %v2721_v38, %v939_v54 }
 0x46c   :  { %3298 = vst [vmem:[#allocation59_spill] sm:$0xff] %v2728_v33  ;;  %v1015_v33 = vmul.f32 %v1010_v19, %v2104_v39  ;;  %v983_v19 = vmul.f32 %v978_v43, %v2117_v23 }
 0x471   :  { %v2730_v41 = vpop.permute.xlu0 %896  ;;  %v2734_v1 = vpop.permute.xlu2 %1024 }
 0x472   :  { %v2732_v50 = vpop.permute.xlu1 %1030 }
 0x473   :  { %3299 = vst [vmem:[#allocation60_spill] sm:$0xff] %v2732_v50 }
 0x479   :  { %v2736_v24 = vpop.permute.xlu0 %1060  ;;  %v2747_v38 = vpop.permute.xlu2 %1128 }
 0x47a   :  { %v993_v28 = vpop.permute.xlu1 %992  ;;  %3300 = vst [vmem:[#allocation61_spill] sm:$0xff] %v2747_v38 }
 0x47b   :  { %v1011_v26 = vsel %vm148_vm4, %v993_v28, %v2661_v17 }
 0x47c   :  { %v1019_v54 = vmul.f32 %v1011_v26, %v2104_v39 }
 0x47e   :  { %1204 = vmatpush.msra.mxu2 %v1019_v54 }
 0x480   :  { %1205 = vmatpush.msra.mxu2 %v1015_v33 }
 0x481   :  { %v2749_v50 = vpop.permute.xlu0 %1028  ;;  %v2765_v33 = vpop.permute.xlu2 %1000 }
 0x482   :  { %1206 = vmatpush.msra.mxu2 %v2429_v49  ;;  %v961_v46 = vpop.permute.xlu1 %960  ;;  %v947_v49 = vsel %vm106_vm6, %v2696_v30, %v2719_v27 }
 0x483   :  { %v979_v26 = vsel %vm127_vm5, %v961_v46, %v2681_v34 }
 0x484   :  { %v987_v39 = vmul.f32 %v979_v26, %v2117_v23  ;;  %v955_v26 = vmul.f32 %v947_v49, %v2143_v36  ;;  %v1670_v49 = vld [vmem:[%s3175_s1 + $0x20] ss:$0 sm:$0xff] }
 0x486   :  { %1207 = vmatpush.msra.mxu2 %v987_v39 }
 0x488   :  { %1208 = vmatpush.msra.mxu2 %v983_v19 }
 0x489   :  { %v2771_v54 = vpop.permute.xlu0 %1004 }
 0x48a   :  { %3301 = vst [vmem:[#allocation62_spill] sm:$0xff] %v2771_v54  ;;  %v1013_v23 = vsel %vm148_vm4, %v2771_v54, %v993_v28  ;;  %1209 = vmatpush.msra.mxu2 %v2441_v52  ;;  %v1125_v43 = vpop.permute.xlu1 %1124  ;;  %v1671_v52 = vld [vmem:[%s3175_s1 + $0x28] ss:$0 sm:$0xff]  ;;  %v1014_v54 = vmul.f32 %v2627_v8, %v2101_v20 }
 0x48b   :  { %v1018_v39 = vmul.f32 %v1013_v23, %v2101_v20  ;;  %v1137_v19 = vsel %vm232_vm0, %v1125_v43, %v2747_v38  ;;  %v1139_v40 = vsel %vm232_vm0, %v2715_v5, %v1125_v43  ;;  %v1142_v38 = vmul.f32 %v1670_v49, %v2604_v42 }
 0x48c   :  { %v1146_v28 = vmul.f32 %v1670_v49, %v1139_v40  ;;  %v1147_v23 = vmul.f32 %v1671_v52, %v1137_v19  ;;  %1210 = vmatpush.msra.mxu2 %v955_v26  ;;  %v1143_v36 = vmul.f32 %v1671_v52, %v2646_v47  ;;  %v2800_v26 = vpop.permute.xlu2 %1100  ;;  %v1043_v43 = vsel %vm169_vm3, %v2734_v1, %v2749_v50  ;;  %v2868_v19 = vld [vmem:[%s3180_s6] sm:$0xff] }
 0x48d   :  { %1164 = vmatpush.msra.mxu0 %v1018_v39  ;;  %v1741_v52 = vmov 88  }
 0x48e   :  { %1185 = vmatpush.msra.mxu1 %v1146_v28  ;;  %1211 = vmatpush.msra.mxu2 %v951_v3  ;;  %v1009_v28 = vsel %vm148_vm4, %v2661_v17, %v2765_v33 }
 0x48f   :  { %1225 = vmatpush.msra.mxu3 %v1147_v23  ;;  %1165 = vmatpush.msra.mxu0 %v1014_v54  ;;  %v1111_v54 = vmul.f32 %v2673_v29, %v2009_v61 }
 0x490   :  { %1186 = vmatpush.msra.mxu1 %v1142_v38  ;;  %1212 = vmatpush.msra.mxu2 %v2463_v59  ;;  %v1078_v38 = vmul.f32 %v2636_v35, %v2015_v0  ;;  %v1050_v35 = vmul.f32 %v1043_v43, %v2084_v55  ;;  %v3313_v43 = vld [vmem:[#allocation57_spill] sm:$0xff] }
 0x491   :  { %1226 = vmatpush.msra.mxu3 %v1143_v36  ;;  %v2797_v14 = vpop.permute.xlu0 %972  ;;  %1166 = vmatpush.msra.mxu0 %v2426_v22  ;;  %v982_v22 = vmul.f32 %v2655_v2, %v2114_v4  ;;  %v914_v2 = vsel %vm85_vm7, %v2600_v9, %v2586_v45  ;;  %v3302_v36 = vld [vmem:[#allocation13_spill] sm:$0xff] }
 0x492   :  { %v981_v20 = vsel %vm127_vm5, %v2797_v14, %v961_v46  ;;  %1187 = vmatpush.msra.mxu1 %v2256_v44  ;;  %v1089_v8 = vpop.permute.xlu1 %1088  ;;  %v1110_v46 = vmul.f32 %v2590_v62, %v2006_v60  ;;  %v1075_v44 = vsel %vm190_vm2, %v2723_v12, %v2736_v24  ;;  %v919_v39 = vmul.f32 %v914_v2, %v2149_v51  ;;  %v3309_v2 = vld [vmem:[#allocation30_spill] sm:$0xff] }
 0x493   :  { %v986_v47 = vmul.f32 %v981_v20, %v2114_v4  ;;  %1227 = vmatpush.msra.mxu3 %v2274_v10  ;;  %v1107_v59 = vsel %vm211_vm1, %v1089_v8, %v2713_v32  ;;  %v1082_v42 = vmul.f32 %v1075_v44, %v2015_v0  ;;  %v1042_v0 = vsel %vm169_vm3, %v2614_v25, %v2612_v15  ;;  %v3303_v20 = vld [vmem:[#allocation25_spill] sm:$0xff] }
 0x494   :  { %v1114_v3 = vmul.f32 %v1107_v59, %v2006_v60  ;;  %1647 = vset.pattern.permute.xlu0 %v1741_v52  ;;  %v1020_v17 = vmul.f32 %v1009_v28, %v3302_v36  ;;  %v3318_v28 = vld [vmem:[#allocation58_spill] sm:$0xff] }
 0x495   :  { %1167 = vmatpush.msra.mxu0 %v986_v47 }
 0x496   :  { %1188 = vmatpush.msra.mxu1 %v1114_v3 }
 0x497   :  { %1168 = vmatpush.msra.mxu0 %v982_v22 }
 0x498   :  { %1189 = vmatpush.msra.mxu1 %v1110_v46 }
 0x499   :  { %v2820_v10 = vpop.permute.xlu0 %1096  ;;  %1169 = vmatpush.msra.mxu0 %v2437_v53 }
 0x49a   :  { %v1105_v4 = vsel %vm211_vm1, %v2713_v32, %v2820_v10  ;;  %1190 = vmatpush.msra.mxu1 %v2264_v58  ;;  %v2829_v60 = vpop.permute.xlu1 %900  ;;  %v2842_v32 = vpop.permute.xlu2 %908 }
 0x49b   :  { %v1115_v62 = vmul.f32 %v1105_v4, %v2009_v61  ;;  %v915_v53 = vsel %vm85_vm7, %v2730_v41, %v2829_v60  ;;  %v1046_v61 = vmul.f32 %v1042_v0, %v2084_v55  ;;  %v3314_v0 = vld [vmem:[#allocation24_spill] sm:$0xff] }
 0x49c   :  { %v923_v58 = vmul.f32 %v915_v53, %v2149_v51  ;;  %1191 = vmatpush.msra.mxu1 %v1082_v42  ;;  %v3308_v42 = vld [vmem:[#allocation10_spill] sm:$0xff] }
 0x49d   :  { %1228 = vmatpush.msra.mxu3 %v1115_v62  ;;  %v3311_v53 = vld [vmem:[#allocation34_spill] sm:$0xff] }
 0x49e   :  { %1192 = vmatpush.msra.mxu1 %v1078_v38  ;;  %1213 = vmatpush.msra.mxu2 %v923_v58 }
 0x49f   :  { %1229 = vmatpush.msra.mxu3 %v1111_v54 }
 0x4a0   :  { %1193 = vmatpush.msra.mxu1 %v2291_v57  ;;  %1214 = vmatpush.msra.mxu2 %v919_v39  ;;  %v2873_v57 = vld [vmem:[%s3180_s6 + $0x8] sm:$0xff] }
 0x4a1   :  { %v2858_v29 = vpop.permute.xlu0 %968  ;;  %1230 = vmatpush.msra.mxu3 %v2278_v11  ;;  %v1672_v11 = vld [vmem:[%s3175_s1 + $0x38] ss:$0 sm:$0xff]  ;;  %1154 = vperm.xlu0 %1647, %v2873_v57  }
 0x4a2   :  { %1194 = vmatpush.msra.mxu1 %v1050_v35  ;;  %1215 = vmatpush.msra.mxu2 %v2471_v37  ;;  %v2863_v51 = vpop.permute.xlu1 %1132  ;;  %v2884_v40 = vpop.permute.xlu2 %936  ;;  %v1145_v49 = vmul.f32 %v1672_v11, %v2669_v48  ;;  %v977_v22 = vsel %vm127_vm5, %v2681_v34, %v2858_v29  ;;  %v3310_v34 = vld [vmem:[#allocation16_spill] sm:$0xff] }
 0x4a3   :  { %1216 = vmatmul.f32.vlgmr.msra.gmra.mxu2 %v2868_v19  ;;  %v1141_v55 = vsel %vm232_vm0, %v2863_v51, %v2715_v5  ;;  %v1109_v5 = vsel %vm211_vm1, %v2800_v26, %v1089_v8  ;;  %v3304_v8 = vld [vmem:[#allocation52_spill] sm:$0xff]  ;;  %v988_v62 = vmul.f32 %v977_v22, %v3310_v34  ;;  %v3327_v22 = vld [vmem:[#allocation27_spill] sm:$0xff] }
 0x4a4   :  { %1195 = vmatpush.msra.mxu1 %v1046_v61  ;;  %v1149_v37 = vmul.f32 %v1672_v11, %v1141_v55  ;;  %v1117_v48 = vmul.f32 %v1109_v5, %v1909_v16  ;;  %v3315_v55 = vld [vmem:[#allocation15_spill] sm:$0xff] }
 0x4a5   :  { %1604 = vmatmul.msk.f32.vlgmr.msra.gmra.mxu1 %vm1157_vm9, %v2873_v57 }
 0x4a6   :  { %1240 = vmatpush.msrb.mxu1 %v2350_v21  ;;  %1305 = vmatpush.msrb.mxu2 %v1149_v37  ;;  %v3316_v37 = vld [vmem:[#allocation42_spill] sm:$0xff] }
 0x4a8   :  { %1241 = vmatpush.msrb.mxu1 %v2579_v31  ;;  %1306 = vmatpush.msrb.mxu2 %v1145_v49  ;;  %v1008_v31 = vsel %vm148_vm4, %v2555_v18, %v2679_v6  ;;  %v1113_v18 = vmul.f32 %v3304_v8, %v1909_v16  ;;  %v3305_v6 = vld [vmem:[#allocation23_spill] sm:$0xff]  ;;  %v3317_v49 = vld [vmem:[#allocation48_spill] sm:$0xff] }
 0x4a9   :  { %v2905_v23 = vpop.permute.xlu0 %1068  ;;  %v1016_v59 = vmul.f32 %v1008_v31, %v3302_v36  ;;  %v3307_v16 = vld [vmem:[#allocation55_spill] sm:$0xff]  ;;  %v1079_v5 = vmul.f32 %v3317_v49, %v3315_v55  ;;  %v3320_v31 = vld [vmem:[#allocation12_spill] sm:$0xff] }
 0x4aa   :  { %1242 = vmatpush.msrb.mxu1 %v2516_v13  ;;  %v2898_v21 = vpop.permute.xlu1 %940  ;;  %1307 = vmatpush.msrb.mxu2 %v2320_v56  ;;  %v1077_v56 = vsel %vm190_vm2, %v2905_v23, %v2723_v12  ;;  %v976_v46 = vsel %vm127_vm5, %v2562_v63, %v3307_v16  ;;  %v2933_v44 = vpop.permute.xlu2 %1036  ;;  %v917_v12 = vsel %vm85_vm7, %v2842_v32, %v2730_v41  ;;  %v3312_v63 = vld [vmem:[#allocation54_spill] sm:$0xff]  ;;  %v3321_v36 = vld [vmem:[#allocation32_spill] sm:$0xff] }
 0x4ab   :  { %v949_v13 = vsel %vm106_vm6, %v2898_v21, %v2696_v30  ;;  %v3306_v30 = vld [vmem:[#allocation47_spill] sm:$0xff]  ;;  %v1085_v4 = vmul.f32 %v1077_v56, %v3308_v42  ;;  %v1081_v58 = vmul.f32 %v3312_v63, %v3308_v42  ;;  %v984_v54 = vmul.f32 %v976_v46, %v3310_v34  ;;  %v3328_v46 = vld [vmem:[#allocation61_spill] sm:$0xff]  ;;  %v1673_v63 = vld [vmem:[%s3175_s1 + $0x30] ss:$0 sm:$0xff] }
 0x4ac   :  { %1243 = vmatpush.msrb.mxu1 %v3303_v20  ;;  %v954_v47 = vmul.f32 %v949_v13, %v3305_v6  ;;  %1308 = vmatpush.msrb.mxu2 %v1117_v48  ;;  %v950_v3 = vmul.f32 %v3306_v30, %v3305_v6  ;;  %v916_v41 = vsel %vm85_vm7, %v3313_v43, %v2600_v9  ;;  %v3323_v20 = vld [vmem:[#allocation36_spill] sm:$0xff]  ;;  %v3324_v6 = vld [vmem:[#allocation43_spill] sm:$0xff]  ;;  %v3329_v42 = vld [vmem:[#allocation21_spill] sm:$0xff] }
 0x4ad   :  { %v922_v35 = vmul.f32 %v917_v12, %v3314_v0  ;;  %v1045_v61 = vsel %vm169_vm3, %v2933_v44, %v2734_v1  ;;  %v945_v9 = vsel %vm106_vm6, %v2719_v27, %v2884_v40  ;;  %v3319_v1 = vld [vmem:[#allocation46_spill] sm:$0xff]  ;;  %v1135_v12 = vsel %vm232_vm0, %v3328_v46, %v2863_v51  ;;  %v3332_v51 = vld [vmem:[#allocation20_spill] sm:$0xff]  ;;  %v3352_v46 = vld [vmem:[#allocation11_spill] sm:$0xff] }
 0x4ae   :  { %1244 = vmatpush.msrb.mxu1 %v1020_v17  ;;  %1170 = vmatpush.msra.mxu0 %v954_v47  ;;  %v944_v52 = vsel %vm106_vm6, %v3319_v1, %v3318_v28  ;;  %v1053_v48 = vmul.f32 %v1045_v61, %v3320_v31  ;;  %v3322_v17 = vld [vmem:[#allocation19_spill] sm:$0xff]  ;;  %v1103_v61 = vsel %vm211_vm1, %v2820_v10, %v2800_v26  ;;  %v3339_v10 = vld [vmem:[#allocation40_spill] sm:$0xff] }
 0x4af   :  { %1309 = vmatpush.msrb.mxu2 %v1113_v18  ;;  %v956_v27 = vmul.f32 %v945_v9, %v3322_v17  ;;  %v952_v8 = vmul.f32 %v944_v52, %v3322_v17  ;;  %v3340_v49 = vld [vmem:[#allocation8_spill] sm:$0xff]  ;;  %v3343_v52 = vld [vmem:[#allocation17_spill] sm:$0xff]  ;;  %v943_v17 = vsel %vm106_vm6, %v2884_v40, %v2898_v21 }
 0x4b0   :  { %1245 = vmatpush.msrb.mxu1 %v1016_v59  ;;  %1171 = vmatpush.msra.mxu0 %v950_v3  ;;  %v3325_v59 = vld [vmem:[#allocation60_spill] sm:$0xff]  ;;  %v3326_v3 = vld [vmem:[#allocation33_spill] sm:$0xff] }
 0x4b1   :  { %1310 = vmatpush.msrb.mxu2 %v3309_v2  ;;  %v2977_v13 = vpop.permute.xlu0 %904  ;;  %v1040_v56 = vsel %vm169_vm3, %v2612_v15, %v3325_v59  ;;  %v3341_v28 = vld [vmem:[#allocation28_spill] sm:$0xff] }
 0x4b2   :  { %1246 = vmatpush.msrb.mxu1 %v3311_v53  ;;  %v2943_v38 = vpop.permute.xlu1 %1064  ;;  %1172 = vmatpush.msra.mxu0 %v3316_v37  ;;  %v2981_v18 = vpop.permute.xlu2 %902  ;;  %v913_v30 = vsel %vm85_vm7, %v2829_v60, %v2977_v13  ;;  %v1047_v2 = vmul.f32 %v1040_v56, %v3329_v42  ;;  %v3333_v53 = vld [vmem:[#allocation38_spill] sm:$0xff]  ;;  %v911_v21 = vsel %vm85_vm7, %v2977_v13, %v2842_v32  ;;  %v3356_v13 = vld [vmem:[#allocation41_spill] sm:$0xff] }
 0x4b3   :  { %1311 = vmatpush.msrb.mxu2 %v1085_v4  ;;  %v1073_v39 = vsel %vm190_vm2, %v2736_v24, %v2943_v38  ;;  %v918_v24 = vmul.f32 %v916_v41, %v3314_v0  ;;  %v912_v60 = vsel %vm85_vm7, %v2586_v45, %v2981_v18  ;;  %v3330_v4 = vld [vmem:[#allocation45_spill] sm:$0xff]  ;;  %v3334_v45 = vld [vmem:[#allocation44_spill] sm:$0xff]  ;;  %v3336_v0 = vld [vmem:[#allocation14_spill] sm:$0xff] }
 0x4b4   :  { %v1083_v11 = vmul.f32 %v1073_v39, %v3315_v55  ;;  %1247 = vmatpush.msrb.mxu1 %v988_v62  ;;  %1173 = vmatpush.msra.mxu0 %v922_v35  ;;  %v924_v62 = vmul.f32 %v913_v30, %v3332_v51  ;;  %v3335_v41 = vld [vmem:[#allocation49_spill] sm:$0xff]  ;;  %v3337_v35 = vld [vmem:[#allocation26_spill] sm:$0xff] }
 0x4b5   :  { %1312 = vmatpush.msrb.mxu2 %v1081_v58  ;;  %v1148_v58 = vmul.f32 %v1673_v63, %v1135_v12  ;;  %v1144_v39 = vmul.f32 %v1673_v63, %v3335_v41  ;;  %v3350_v30 = vld [vmem:[#allocation37_spill] sm:$0xff] }
 0x4b6   :  { %1248 = vmatpush.msrb.mxu1 %v984_v54  ;;  %1231 = vmatpush.msra.mxu3 %v1083_v11  ;;  %v920_v54 = vmul.f32 %v912_v60, %v3332_v51  ;;  %v3338_v11 = vld [vmem:[#allocation50_spill] sm:$0xff] }
 0x4b7   :  { %1313 = vmatpush.msrb.mxu2 %v3321_v36  ;;  %1174 = vmatpush.msra.mxu0 %v918_v24  ;;  %v1017_v37 = vmul.f32 %v3338_v11, %v3336_v0  ;;  %v975_v24 = vsel %vm127_vm5, %v2858_v29, %v2797_v14  ;;  %v3344_v36 = vld [vmem:[#allocation35_spill] sm:$0xff]  ;;  %v1071_v14 = vsel %vm190_vm2, %v2943_v38, %v2905_v23  ;;  %v3345_v29 = vld [vmem:[#allocation56_spill] sm:$0xff]  ;;  %v3348_v23 = vld [vmem:[#allocation53_spill] sm:$0xff] }
 0x4b8   :  { %1249 = vmatpush.msrb.mxu1 %v3323_v20  ;;  %1232 = vmatpush.msra.mxu3 %v1079_v5  ;;  %v1116_v5 = vmul.f32 %v1103_v61, %v3340_v49 }
 0x4b9   :  { %1314 = vmatpush.msrb.mxu2 %v1053_v48  ;;  %1175 = vmatpush.msra.mxu0 %v3324_v6  ;;  %v989_v48 = vmul.f32 %v975_v24, %v3343_v52  ;;  %v3349_v6 = vld [vmem:[#allocation18_spill] sm:$0xff] }
 0x4ba   :  { %1250 = vmatpush.msrb.mxu1 %v956_v27  ;;  %v1033_v47 = vpop.permute.xlu1 %1032  ;;  %1233 = vmatpush.msra.mxu3 %v3327_v22  ;;  %v3346_v27 = vld [vmem:[#allocation9_spill] sm:$0xff]  ;;  %v957_v56 = vmul.f32 %v943_v17, %v3349_v6  ;;  %v3351_v22 = vld [vmem:[#allocation59_spill] sm:$0xff] }
 0x4bb   :  { %1280 = vmatpush.msrb.mxu0 %v3326_v3  ;;  %v1041_v16 = vsel %vm169_vm3, %v2749_v50, %v1033_v47  ;;  %v3331_v50 = vld [vmem:[#allocation62_spill] sm:$0xff]  ;;  %v1084_v20 = vmul.f32 %v1071_v14, %v3346_v27  ;;  %v1080_v38 = vmul.f32 %v3348_v23, %v3346_v27  ;;  %v1039_v3 = vsel %vm169_vm3, %v1033_v47, %v2933_v44 }
 0x4bc   :  { %v1051_v15 = vmul.f32 %v1041_v16, %v3329_v42  ;;  %1251 = vmatpush.msrb.mxu1 %v952_v8  ;;  %1176 = vmatmul.f32.vlgmr.msra.gmra.mxu0 %v2868_v19  ;;  %v1007_v34 = vsel %vm148_vm4, %v2765_v33, %v3331_v50  ;;  %v3347_v8 = vld [vmem:[#allocation29_spill] sm:$0xff]  ;;  %v953_v40 = vmul.f32 %v3351_v22, %v3349_v6  ;;  %v3353_v42 = vld [vmem:[#allocation31_spill] sm:$0xff]  ;;  %v3354_v47 = vld [vmem:[#allocation22_spill] sm:$0xff]  ;;  %v3357_v22 = vlaneseq }
 0x4bd   :  { %1281 = vmatpush.msrb.mxu0 %v3330_v4  ;;  %v1021_v33 = vmul.f32 %v1007_v34, %v3336_v0  ;;  %v1052_v12 = vmul.f32 %v1039_v3, %v3352_v46  ;;  %v910_v44 = vsel %vm85_vm7, %v2981_v18, %v3313_v43  ;;  %v3355_v4 = vld [vmem:[#allocation39_spill] sm:$0xff]  ;;  %v1324_v43 = vld [vmem:[%s3181_s7] sm:$0x1]  ;;  %v1742_v18 = vmov 8  }
 0x4be   :  { %1252 = vmatpush.msrb.mxu1 %v3333_v53  ;;  %1234 = vmatpush.msra.mxu3 %v1051_v15  ;;  %v925_v15 = vmul.f32 %v911_v21, %v3354_v47  ;;  %v921_v32 = vmul.f32 %v910_v44, %v3354_v47  ;;  %vm3119_vm14 = vcmp.lt.s32.totalorder %v3357_v22, 512 }
 0x4bf   :  { %1282 = vmatpush.msrb.mxu0 %v3334_v45  ;;  %1648 = vset.pattern.permute.xlu1 %v1742_v18 }
 0x4c0   :  { %1253 = vmatpush.msrb.mxu1 %v924_v62  ;;  %1235 = vmatpush.msra.mxu3 %v1047_v2 }
 0x4c1   :  { %1283 = vmatpush.msrb.mxu0 %v3337_v35  ;;  %1605 = vmatmul.msk.f32.vlgmr.msra.gmra.mxu3 %vm1157_vm9, %v2873_v57 }
 0x4c2   :  { %1265 = vmatpush.msrb.mxu3 %v1148_v58  ;;  %1254 = vmatpush.msrb.mxu1 %v920_v54  ;;  %v1035_v55 = vpop.permute.xlu1 %1034 }
 0x4c3   :  { %1284 = vmatpush.msrb.mxu0 %v1021_v33  ;;  %v1044_v9 = vsel %vm169_vm3, %v1035_v55, %v2614_v25  ;;  %v3342_v25 = vld [vmem:[#allocation51_spill] sm:$0xff]  ;;  %v1038_v16 = vsel %vm169_vm3, %v3325_v59, %v1035_v55  ;;  %1649 = vset.pattern.permute.xlu0 %v1742_v18 }
 0x4c4   :  { %1266 = vmatpush.msrb.mxu3 %v1144_v39  ;;  %v1049_v26 = vmul.f32 %v1044_v9, %v3320_v31  ;;  %1255 = vmatpush.msrb.mxu1 %v3339_v10  ;;  %v1112_v1 = vmul.f32 %v3342_v25, %v3340_v49  ;;  %v985_v31 = vmul.f32 %v3345_v29, %v3343_v52 }
 0x4c5   :  { %1285 = vmatpush.msrb.mxu0 %v1017_v37  ;;  %1256 = vmatmul.f32.vlgmr.msrb.gmra.mxu1 %v2868_v19  ;;  %v1048_v60 = vmul.f32 %v1038_v16, %v3352_v46 }
 0x4c6   :  { %1267 = vmatpush.msrb.mxu3 %v3341_v28  ;;  %1315 = vmatpush.msrb.mxu2 %v1049_v26  ;;  %v1743_v26 = vmov 0.0  }
 0x4c7   :  { %1286 = vmatpush.msrb.mxu0 %v3344_v36  ;;  %1607 = vmatmul.msk.f32.vlgmr.msrb.gmra.mxu2 %vm1157_vm9, %v2873_v57  ;;  %1578 = vst [vmem:[%s3183_s9] sm:$0xf0] %v1743_v26 }
 0x4c8   :  { %1268 = vmatpush.msrb.mxu3 %v1116_v5  ;;  %1327 = vperm.xlu1 %1648, %v1324_v43   ;;  %1579 = vst [vmem:[%s3183_s9 + $0x8] sm:$0xf0] %v1743_v26 }
 0x4c9   :  { %1287 = vmatpush.msrb.mxu0 %v989_v48  ;;  %1580 = vst [vmem:[%s3183_s9 + $0x10] sm:$0xf0] %v1743_v26 }
 0x4ca   :  { %1269 = vmatpush.msrb.mxu3 %v1112_v1  ;;  %1581 = vst [vmem:[%s3183_s9 + $0x18] sm:$0xf0] %v1743_v26 }
 0x4cb   :  { %1288 = vmatpush.msrb.mxu0 %v985_v31 }
 0x4cc   :  { %1270 = vmatpush.msrb.mxu3 %v3347_v8 }
 0x4cd   :  { %1289 = vmatpush.msrb.mxu0 %v3350_v30 }
 0x4ce   :  { %1271 = vmatpush.msrb.mxu3 %v1084_v20 }
 0x4cf   :  { %1290 = vmatpush.msrb.mxu0 %v957_v56 }
 0x4d0   :  { %1272 = vmatpush.msrb.mxu3 %v1080_v38 }
 0x4d1   :  { %1291 = vmatpush.msrb.mxu0 %v953_v40 }
 0x4d2   :  { %1273 = vmatpush.msrb.mxu3 %v3353_v42 }
 0x4d3   :  { %1292 = vmatpush.msrb.mxu0 %v3355_v4 }
 0x4d4   :  { %1274 = vmatpush.msrb.mxu3 %v1052_v12 }
 0x4d5   :  { %1293 = vmatpush.msrb.mxu0 %v925_v15 }
 0x4d6   :  { %1275 = vmatpush.msrb.mxu3 %v1048_v60 }
 0x4d7   :  { %1606 = vmatmul.msk.f32.vlgmr.msrb.gmra.mxu3 %vm1157_vm9, %v2873_v57  ;;  %1294 = vmatpush.msrb.mxu0 %v921_v32 }
 0x4d9   :  { %1295 = vmatpush.msrb.mxu0 %v3356_v13 }
 0x4da   :  { %1296 = vmatmul.f32.vlgmr.msrb.gmra.mxu0 %v2868_v19 }
 0x513   :  { %v1155_v7 = vpop.permute.xlu0 %1154 }
 0x522   :  { %v1197_v2 = vpop.f32.mrf.mxu1 }
 0x526   :  { %v1217_v57 = vpop.f32.mrf.mxu2 }
 0x527   :  { %v1218_v19 = vadd.f32 %v1217_v57, %v1155_v7 }
 0x539   :  { %v1177_v59 = vpop.f32.mrf.mxu0 }
 0x53a   :  { %v1178_v50 = vadd.f32 %v1177_v59, %v1155_v7  ;;  %v1328_v11 = vpop.permute.xlu1 %1327 }
 0x53b   :  { %v1330_v9 = vperm.slane %v1328_v11, 0 }
 0x53c   :  { %v1198_v34 = vadd.f32 %v1197_v2, %v1178_v50 }
 0x53e   :  { %v1320_v51 = vmax.f32 %v1198_v34, 0.0 }
 0x540   :  { %1349 = vmatpush.msra.mxu3 %v1320_v51 }
 0x541   :  { %1608 = vmatmul.msk.f32.vlgmr.msra.gmra.mxu3 %vm1331_vm10, %v1324_v43 }
 0x542   :  { %v1257_v58 = vpop.f32.mrf.mxu1 }
 0x543   :  { %v1258_v41 = vadd.f32 %v1257_v58, %v1155_v7 }
 0x544   :  { %v1237_v62 = vpop.f32.mrf.mxu3 }
 0x545   :  { %v1238_v53 = vadd.f32 %v1237_v62, %v1218_v19 }
 0x547   :  { %v1321_v63 = vmax.f32 %v1238_v53, 0.0 }
 0x549   :  { %1369 = vmatpush.msrb.mxu3 %v1321_v63 }
 0x54a   :  { %1609 = vmatmul.msk.f32.vlgmr.msrb.gmra.mxu3 %vm1331_vm10, %v1324_v43  ;;  %v1317_v54 = vpop.f32.mrf.mxu2 }
 0x557   :  { %v1297_v45 = vpop.f32.mrf.mxu0 }
 0x558   :  { %v1298_v39 = vadd.f32 %v1297_v45, %v1155_v7 }
 0x55a   :  { %v1277_v0 = vpop.f32.mrf.mxu3  ;;  %v1318_v33 = vadd.f32 %v1317_v54, %v1298_v39 }
 0x55b   :  { %v1278_v35 = vadd.f32 %v1277_v0, %v1258_v41 }
 0x55c   :  { %v1323_v61 = vmax.f32 %v1318_v33, 0.0 }
 0x55d   :  { %v1322_v55 = vmax.f32 %v1278_v35, 0.0 }
 0x55e   :  { %1409 = vmatpush.msra.mxu2 %v1323_v61 }
 0x55f   :  { %1389 = vmatpush.msra.mxu1 %v1322_v55  ;;  %1611 = vmatmul.msk.f32.vlgmr.msra.gmra.mxu2 %vm1331_vm10, %v1324_v43 }
 0x560   :  { %1610 = vmatmul.msk.f32.vlgmr.msra.gmra.mxu1 %vm1331_vm10, %v1324_v43 }
 0x5c4   :  { %v1351_v37 = vpop.f32.mrf.mxu3 }
 0x5c5   :  { %v1352_v24 = vadd.f32 %v1351_v37, %v1330_v9 }
 0x5c7   :  { %v1612_v10 = vmul.f32 -1.442695, %v1352_v24 }
 0x5c9   :  { %1654 = vpow2.f32 %v1612_v10 }
 0x5cd   :  { %v1371_v49 = vpop.f32.mrf.mxu3 }
 0x5ce   :  { %v1372_v5 = vadd.f32 %v1371_v49, %v1330_v9 }
 0x5cf   :  { %v1655_v25 = vpop.eup %1654 }
 0x5d0   :  { %v1613_v28 = vmul.f32 -1.442695, %v1372_v5  ;;  %v3114_v48 = vadd.f32 1.0, %v1655_v25  ;;  %v1496_v27 = vrot.slane %v1372_v5, 7 }
 0x5d2   :  { %1656 = vpow2.f32 %v1613_v28  ;;  %v1500_v3 = vsel %vm1499_vm11, %v1352_v24, %v1496_v27  ;;  %vm1435_vm2 = vweird.f32 %v3114_v48  ;;  %v1439_v2 = vand.u32 2147483647, %v3114_v48 }
 0x5d3   :  { %v1441_v51 = vand.u32 2147483648, %v3114_v48 }
 0x5d4   :  { %vm1440_vm8 = vcmp.eq.f32.partialorder %v1439_v2, 8.507059e+37 }
 0x5d5   :  { %v1442_v39 = vor.u32 1.1754944e-38, %v1441_v51 }
 0x5d8   :  { %v1657_v1 = vpop.eup %1656 }
 0x5d9   :  { %v1427_v52 = vadd.f32 1.0, %v1657_v1 }
 0x5db   :  { %1658 = vrcp.f32 %v1427_v52  ;;  %vm1450_vm15 = vweird.f32 %v1427_v52  ;;  %v1456_v60 = vand.u32 2147483648, %v1427_v52  ;;  %v1454_v7 = vand.u32 2147483647, %v1427_v52 }
 0x5dc   :  { %1660 = vrcp.f32 %v3114_v48 }
 0x5dd   :  { %v1391_v36 = vpop.f32.mrf.mxu1  ;;  %v1457_v50 = vor.u32 1.1754944e-38, %v1456_v60  ;;  %vm1455_vm4 = vcmp.eq.f32.partialorder %v1454_v7, 8.507059e+37 }
 0x5de   :  { %v1392_v14 = vadd.f32 %v1391_v36, %v1330_v9 }
 0x5e0   :  { %v1614_v29 = vmul.f32 -1.442695, %v1392_v14  ;;  %v1497_v8 = vrot.slane %v1392_v14, 6 }
 0x5e1   :  { %v1659_v31 = vpop.eup %1658 }
 0x5e2   :  { %1662 = vpow2.f32 %v1614_v29  ;;  %v1411_v17 = vpop.f32.mrf.mxu2  ;;  %v1446_v20 = vmul.f32 %v1659_v31, %v1427_v52  ;;  %v1661_v38 = vpop.eup %1660  ;;  %vm1451_vm0 = vweird.f32 %v1659_v31 }
 0x5e3   :  { %v1412_v23 = vadd.f32 %v1411_v17, %v1330_v9  ;;  %v1431_v12 = vmul.f32 %v1661_v38, %v3114_v48  ;;  %vm3131_vm1 = vmor %vm1450_vm15, %vm1451_vm0  ;;  %vm1436_vm3 = vweird.f32 %v1661_v38 }
 0x5e4   :  { %v1447_v21 = vsub.f32 1.0, %v1446_v20  ;;  %vm3140_vm6 = vmor %vm1435_vm2, %vm1436_vm3 }
 0x5e5   :  { %v1615_v6 = vmul.f32 -1.442695, %v1412_v23  ;;  %v1498_v56 = vrot.slane %v1412_v23, 5  ;;  %v1432_v47 = vsub.f32 1.0, %v1431_v12 }
 0x5e6   :  { %v1448_v44 = vmul.f32 %v1659_v31, %v1447_v21 }
 0x5e7   :  { %1664 = vpow2.f32 %v1615_v6  ;;  %v1502_v46 = vsel %vm1501_vm12, %v1497_v8, %v1498_v56  ;;  %v1433_v43 = vmul.f32 %v1661_v38, %v1432_v47 }
 0x5e8   :  { %v1663_v30 = vpop.eup %1662  ;;  %v1504_v42 = vsel %vm1503_vm13, %v1500_v3, %v1502_v46  ;;  %v1449_v13 = vadd.f32 %v1659_v31, %v1448_v44 }
 0x5e9   :  { %v1428_v16 = vadd.f32 1.0, %v1663_v30  ;;  %1510 = vst.msk [vmem:[%s3183_s9] ss:$8 sm:$0xf] %vm3119_vm14, %v1504_v42  ;;  %v1434_v62 = vadd.f32 %v1661_v38, %v1433_v43 }
 0x5ea   :  { %v1453_v57 = vsel %vm3131_vm1, %v1659_v31, %v1449_v13 }
 0x5eb   :  { %1666 = vrcp.f32 %v1428_v16  ;;  %v1471_v19 = vand.u32 2147483648, %v1428_v16  ;;  %v1469_v63 = vand.u32 2147483647, %v1428_v16  ;;  %v1458_v45 = vsel %vm1455_vm4, %v1457_v50, %v1453_v57 }
 0x5ec   :  { %vm1465_vm7 = vweird.f32 %v1428_v16  ;;  %v1438_v33 = vsel %vm3140_vm6, %v1661_v38, %v1434_v62  ;;  %v1618_v55 = vadd.f32 -0.5, %v1458_v45  ;;  %vm1553_vm15 = vcmp.gt.f32.partialorder %v1458_v45, 0.5 }
 0x5ed   :  { %v1665_v15 = vpop.eup %1664  ;;  %v1472_v0 = vor.u32 1.1754944e-38, %v1471_v19  ;;  %vm1470_vm10 = vcmp.eq.f32.partialorder %v1469_v63, 8.507059e+37  ;;  %v1443_v9 = vsel %vm1440_vm8, %v1442_v39, %v1438_v33  ;;  %v1623_v25 = vsel %vm1553_vm15, 1.0, %v1743_v26 }
 0x5ee   :  { %v1429_v4 = vadd.f32 1.0, %v1665_v15  ;;  %v1531_v28 = vand.u32 2147483647, %v1618_v55  ;;  %v1516_v52 = vrot.slane %v1458_v45, 7  ;;  %v1617_v48 = vadd.f32 -0.5, %v1443_v9 }
 0x5ef   :  { %v1568_v27 = vrot.slane %v1623_v25, 7 }
 0x5f0   :  { %1668 = vrcp.f32 %v1429_v4  ;;  %v1486_v24 = vand.u32 2147483648, %v1429_v4  ;;  %v1484_v49 = vand.u32 2147483647, %v1429_v4  ;;  %vm1480_vm2 = vweird.f32 %v1429_v4 }
 0x5f1   :  { %v1667_v32 = vpop.eup %1666  ;;  %v1535_v17 = vmul.f32 2.0, %v1531_v28  ;;  %v1519_v6 = vsel %vm1499_vm11, %v1443_v9, %v1516_v52  ;;  %v1530_v56 = vand.u32 2147483647, %v1617_v48 }
 0x5f2   :  { %v1461_v59 = vmul.f32 %v1667_v32, %v1428_v16  ;;  %vm1466_vm5 = vweird.f32 %v1667_v32  ;;  %v1487_v36 = vor.u32 1.1754944e-38, %v1486_v24  ;;  %vm1485_vm4 = vcmp.eq.f32.partialorder %v1484_v49, 8.507059e+37 }
 0x5f3   :  { %vm1467_vm9 = vmor %vm1465_vm7, %vm1466_vm5  ;;  %vm1552_vm5 = vcmp.gt.f32.partialorder %v1443_v9, 0.5  ;;  %v1542_v44 = vrot.slane %v1535_v17, 7 }
 0x5f4   :  { %v1462_v34 = vsub.f32 1.0, %v1461_v59  ;;  %v1622_v12 = vsel %vm1552_vm5, 1.0, %v1743_v26 }
 0x5f5   :  { %v1571_v47 = vsel %vm1499_vm11, %v1622_v12, %v1568_v27 }
 0x5f6   :  { %v1463_v53 = vmul.f32 %v1667_v32, %v1462_v34  ;;  %v1669_v41 = vpop.eup %1668 }
 0x5f7   :  { %v1476_v61 = vmul.f32 %v1669_v41, %v1429_v4  ;;  %vm1481_vm0 = vweird.f32 %v1669_v41 }
 0x5f8   :  { %v1464_v54 = vadd.f32 %v1667_v32, %v1463_v53  ;;  %vm1482_vm3 = vmor %vm1480_vm2, %vm1481_vm0 }
 0x5f9   :  { %v1477_v37 = vsub.f32 1.0, %v1476_v61 }
 0x5fa   :  { %v1468_v35 = vsel %vm1467_vm9, %v1667_v32, %v1464_v54  ;;  %v1534_v32 = vmul.f32 2.0, %v1530_v56 }
 0x5fb   :  { %v1473_v11 = vsel %vm1470_vm10, %v1472_v0, %v1468_v35  ;;  %v1478_v10 = vmul.f32 %v1669_v41, %v1477_v37 }
 0x5fc   :  { %v1619_v5 = vadd.f32 -0.5, %v1473_v11  ;;  %vm1554_vm1 = vcmp.gt.f32.partialorder %v1473_v11, 0.5  ;;  %v1517_v8 = vrot.slane %v1473_v11, 6 }
 0x5fd   :  { %v1479_v1 = vadd.f32 %v1669_v41, %v1478_v10  ;;  %v1624_v31 = vsel %vm1554_vm1, 1.0, %v1743_v26 }
 0x5fe   :  { %v1532_v29 = vand.u32 2147483647, %v1619_v5  ;;  %v1569_v3 = vrot.slane %v1624_v31, 6 }
 0x5ff   :  { %v1483_v14 = vsel %vm1482_vm3, %v1669_v41, %v1479_v1 }
 0x600   :  { %v1488_v20 = vsel %vm1485_vm4, %v1487_v36, %v1483_v14  ;;  %v1536_v16 = vmul.f32 2.0, %v1532_v29 }
 0x601   :  { %v1518_v23 = vrot.slane %v1488_v20, 5  ;;  %v1620_v38 = vadd.f32 -0.5, %v1488_v20  ;;  %vm1555_vm6 = vcmp.gt.f32.partialorder %v1488_v20, 0.5 }
 0x602   :  { %v1625_v30 = vsel %vm1555_vm6, 1.0, %v1743_v26  ;;  %v1543_v13 = vrot.slane %v1536_v16, 6  ;;  %v1545_v26 = vsel %vm1499_vm11, %v1534_v32, %v1542_v44 }
 0x603   :  { %v1520_v22 = vsel %vm1501_vm12, %v1517_v8, %v1518_v23  ;;  %v1533_v21 = vand.u32 2147483647, %v1620_v38  ;;  %v1570_v46 = vrot.slane %v1625_v30, 5 }
 0x604   :  { %v1521_v42 = vsel %vm1503_vm13, %v1519_v6, %v1520_v22 }
 0x605   :  { %1616 = vst.msk [vmem:[%s3183_s9 + $0x1] ss:$8 sm:$0xf] %vm3119_vm14, %v1521_v42  ;;  %v1537_v15 = vmul.f32 2.0, %v1533_v21  ;;  %v1572_v60 = vsel %vm1501_vm12, %v1569_v3, %v1570_v46 }
 0x606   :  { %v1573_v4 = vsel %vm1503_vm13, %v1571_v47, %v1572_v60 }
 0x607   :  { %v1544_v7 = vrot.slane %v1537_v15, 5  ;;  %1626 = vst.msk [vmem:[%s3183_s9 + $0x3] ss:$8 sm:$0xf] %vm3119_vm14, %v1573_v4 }
 0x609   :  { %v1546_v43 = vsel %vm1501_vm12, %v1543_v13, %v1544_v7 }
 0x60a   :  { %v1547_v18 = vsel %vm1503_vm13, %v1545_v26, %v1546_v43 }
 0x60b   :  { %1621 = vst.msk [vmem:[%s3183_s9 + $0x2] ss:$8 sm:$0xf] %vm3119_vm14, %v1547_v18 }
 0x60c   :  { %1590 = vsyncpa [#allocation3], 1 }
 0x60d   :  { %1591 = vsyncpa [#allocation5], 1 }

// kernel: _forward_jit.3
= control target key start
LH: loop header
LB: loop body
LE: loop exit
PB: predicated region body
PF: predicated region fallthrough
CT: control target
= control target key end

     0   :  { %vm35_vm0 = vcmask 1040384   ;;  %v137_v2 = vmov 17   ;;  %vm30_vm1 = vcmask 138240   ;;  %v138_v7 = vmov 16   ;;  %s187_s0 = inlined_call_operand.vmem [shape: f32[17,128], index: 0, kind: input, shape index: {}]   ;;  %s188_s1 = inlined_call_operand.vmem [shape: f32[16,18], index: 1, kind: input, shape index: {}]   ;;  %s189_s2 = inlined_call_operand.vmem [shape: f32[1,17], index: 2, kind: input, shape index: {}]   ;;  %s190_s3 = inlined_call_operand.vmem [shape: f32[8,128], index: 3, kind: output, shape index: {}]  }
   0x1   :  { %v16_v0 = vld [vmem:[%s187_s0 + $0x10] sm:$0x1]  ;;  %v15_v1 = vld [vmem:[%s187_s0 + $0x8] sm:$0xff]  ;;  %130 = vset.pattern.permute.xlu0 %v137_v2  ;;  %v14_v4 = vld [vmem:[%s187_s0] sm:$0xff]  ;;  %131 = vset.pattern.permute.xlu1 %v138_v7  ;;  %vm70_vm2 = vcmask 130048   ;;  %v139_v18 = vmov 0.0  }
   0x2   :  { %119 = vmatpush.msk.msra.mxu0 %vm35_vm0, %v16_v0  ;;  %124 = vmatpush.msk.msra.mxu2 %vm35_vm0, %v16_v0  ;;  %v18_v3 = vld [vmem:[%s188_s1 + $0x8] sm:$0xff]  ;;  %v17_v5 = vld [vmem:[%s188_s1] sm:$0xff]  ;;  %114 = vst [vmem:[%s190_s3 + $0x2] sm:$0x3f] %v139_v18 }
   0x3   :  { %27 = vperm.xlu0 %130, %v18_v3   ;;  %v19_v6 = vld [vmem:[%s189_s2] sm:$0x1] }
   0x4   :  { %53 = vmatpush.msra.mxu0 %v15_v1  ;;  %125 = vmatpush.msra.mxu2 %v15_v1 }
   0x5   :  { %66 = vperm.xlu1 %131, %v19_v6  }
   0x6   :  { %54 = vmatpush.msra.mxu0 %v14_v4  ;;  %126 = vmatpush.msra.mxu2 %v14_v4 }
   0x7   :  { %120 = vmatmul.msk.f32.vlgmr.msra.gmra.mxu0 %vm30_vm1, %v17_v5  ;;  %121 = vmatmul.msk.f32.vlgmr.msra.gmra.mxu2 %vm30_vm1, %v18_v3 }
   0xb   :  { %22 = vperm.xlu0 %130, %v17_v5  }
  0x13   :  { %132 = vset.pattern.permute.xlu0 %v138_v7 }
  0x75   :  { %v28_v8 = vpop.permute.xlu0 %27 }
  0x77   :  { %v67_v16 = vpop.permute.xlu1 %66 }
  0x78   :  { %v69_v17 = vperm.slane %v67_v16, 0 }
  0x7d   :  { %v23_v9 = vpop.permute.xlu0 %22 }
  0x84   :  { %v56_v10 = vpop.f32.mrf.mxu0 }
  0x85   :  { %v57_v12 = vadd.f32 %v56_v10, %v23_v9 }
  0x87   :  { %v62_v15 = vmax.f32 %v57_v12, 0.0 }
  0x8a   :  { %v59_v11 = vpop.f32.mrf.mxu2 }
  0x8b   :  { %v60_v13 = vadd.f32 %v59_v11, %v28_v8 }
  0x8d   :  { %v63_v14 = vmax.f32 %v60_v13, 0.0 }
  0x8f   :  { %87 = vmatpush.msra.mxu1 %v63_v14 }
  0x91   :  { %88 = vmatpush.msra.mxu1 %v62_v15 }
  0x92   :  { %122 = vmatmul.msk.f32.vlgmr.msra.gmra.mxu1 %vm70_vm2, %v19_v6 }
 0x10f   :  { %v90_v19 = vpop.f32.mrf.mxu1 }
 0x110   :  { %v91_v20 = vadd.f32 %v90_v19, %v69_v17 }
 0x112   :  { %93 = vst [vmem:[%s190_s3] sm:$0x1] %v91_v20  ;;  %v123_v21 = vmul.f32 -1.442695, %v91_v20 }
 0x114   :  { %133 = vpow2.f32 %v123_v21 }
 0x11a   :  { %v134_v22 = vpop.eup %133 }
 0x11b   :  { %v97_v23 = vadd.f32 1.0, %v134_v22 }
 0x11d   :  { %135 = vrcp.f32 %v97_v23  ;;  %v109_v27 = vand.u32 2147483648, %v97_v23  ;;  %v107_v29 = vand.u32 2147483647, %v97_v23  ;;  %vm103_vm4 = vweird.f32 %v97_v23 }
 0x11f   :  { %v110_v31 = vor.u32 1.1754944e-38, %v109_v27  ;;  %vm108_vm6 = vcmp.eq.f32.partialorder %v107_v29, 8.507059e+37 }
 0x123   :  { %v136_v24 = vpop.eup %135 }
 0x124   :  { %v99_v25 = vmul.f32 %v136_v24, %v97_v23  ;;  %vm104_vm3 = vweird.f32 %v136_v24 }
 0x125   :  { %vm105_vm5 = vmor %vm103_vm4, %vm104_vm3 }
 0x126   :  { %v100_v26 = vsub.f32 1.0, %v99_v25 }
 0x128   :  { %v101_v28 = vmul.f32 %v136_v24, %v100_v26 }
 0x12a   :  { %v102_v30 = vadd.f32 %v136_v24, %v101_v28 }
 0x12c   :  { %v106_v32 = vsel %vm105_vm5, %v136_v24, %v102_v30 }
 0x12d   :  { %v111_v33 = vsel %vm108_vm6, %v110_v31, %v106_v32 }
 0x12e   :  { %113 = vst [vmem:[%s190_s3 + $0x1] sm:$0x1] %v111_v33 }

// kernel: squeeze.12
= control target key start
LH: loop header
LB: loop body
LE: loop exit
PB: predicated region body
PF: predicated region fallthrough
CT: control target
= control target key end

     0   :  { %s130_s0 = inlined_call_operand.vmem [shape: f32[512], index: 0, kind: input, shape index: {}]   ;;  %s131_s1 = inlined_call_operand.hbm [shape: f32[2,1,16,16], index: 1, kind: output, shape index: {}]  }
   0x1   :  { %v5_v0 = vld [vmem:[%s130_s0] sm:$0xf] }
   0x2   :  { %6 = vst [vmem:[#allocation2] sm:$0xf] %v5_v0 }
   0x3   :  { %2 = vsyncpa [#allocation1], 0  ;;  %s98_s0 = smov 112   ;;  %s99_s8 = smov 80   ;;  %vm8_vm0 = vcmask 130048  }
   0x4   :  { %s100_s9 = smov 48   ;;  %s101_s10 = smov 96  }
   0x5   :  { %s102_s11 = smov 64   ;;  %s103_s12 = smov 32  }
   0x6   :  { %s104_s13 = smov 16   ;;  %s105_s14 = smov [#allocation0]  }
   0x7   :  { %s55_s15 = sshll.u32 %s105_s14, 4  ;;  %s57_s1 = sshll.u32 %s131_s1, 4  ;;  %s56_s15 = int_to_ptr.vmem [resolvable:$true] %s55_s15  ;;  %s58_s1 = int_to_ptr.hbm [resolvable:$true] %s57_s1 }
   0x9   :  { %v10_v1 = vld [vmem:[#allocation2] sm:$0xf]  }
   0xa   :  { %v22_v2 = vld [vmem:[#allocation2] sm:$0xf]   ;;  %11 = vrot.lane.b32.xlu0 %v10_v1, %s98_s0 }
   0xb   :  { %23 = vrot.lane.b32.xlu1 %v22_v2, %s99_s8  ;;  %v34_v3 = vld [vmem:[#allocation2] sm:$0xf]  }
   0xc   :  { %35 = vrot.lane.b32.xlu2 %v34_v3, %s100_s9  ;;  %v16_v4 = vld [vmem:[#allocation2] sm:$0xf]  }
   0xd   :  { %v28_v5 = vld [vmem:[#allocation2] sm:$0xf]  }
   0xe   :  { %v40_v6 = vld [vmem:[#allocation2] sm:$0xf]  }
   0xf   :  { %v46_v7 = vld [vmem:[#allocation2] sm:$0xf]  }
  0x10   :  { %v7_v9 = vld [vmem:[#allocation2] sm:$0xf]  }
  0x11   :  { %9 = vst.msk [vmem:[#allocation0] ss:$8 sm:$0xf] %vm8_vm0, %v7_v9  }
  0x12   :  { %17 = vrot.lane.b32.xlu0 %v16_v4, %s101_s10 }
  0x13   :  { %29 = vrot.lane.b32.xlu1 %v28_v5, %s102_s11 }
  0x14   :  { %41 = vrot.lane.b32.xlu2 %v40_v6, %s103_s12 }
  0x1a   :  { %47 = vrot.lane.b32.xlu0 %v46_v7, %s104_s13 }
  0x66   :  { %v36_v8 = vpop.permute.xlu2 %35  }
  0x67   :  { %39 = vst.msk [vmem:[#allocation0 + $0x5] ss:$8 sm:$0xf] %vm8_vm0, %v36_v8  }
  0x6e   :  { %v42_v10 = vpop.permute.xlu2 %41  }
  0x6f   :  { %45 = vst.msk [vmem:[#allocation0 + $0x6] ss:$8 sm:$0xf] %vm8_vm0, %v42_v10  }
  0x7c   :  { %v12_v11 = vpop.permute.xlu0 %11  }
  0x7d   :  { %v24_v12 = vpop.permute.xlu1 %23   ;;  %15 = vst.msk [vmem:[#allocation0 + $0x1] ss:$8 sm:$0xf] %vm8_vm0, %v12_v11  }
  0x7e   :  { %27 = vst.msk [vmem:[#allocation0 + $0x3] ss:$8 sm:$0xf] %vm8_vm0, %v24_v12  }
  0x84   :  { %v18_v13 = vpop.permute.xlu0 %17  }
  0x85   :  { %v30_v14 = vpop.permute.xlu1 %29   ;;  %21 = vst.msk [vmem:[#allocation0 + $0x2] ss:$8 sm:$0xf] %vm8_vm0, %v18_v13  }
  0x86   :  { %33 = vst.msk [vmem:[#allocation0 + $0x4] ss:$8 sm:$0xf] %vm8_vm0, %v30_v14  }
  0x8c   :  { %v48_v15 = vpop.permute.xlu0 %47  }
  0x8d   :  { %51 = vst.msk [vmem:[#allocation0 + $0x7] ss:$8 sm:$0xf] %vm8_vm0, %v48_v15  }
  0x8e   :  { %60 = dma.vmem_to_hbm [thread:$0]  %s56_s15, 512, %s58_s1, [#allocation1]  }
  0x8f   :  { %96 = dma.done.wait [#allocation1], 512  }
  0x90   :  { %97 = vsyncadd [#allocation1], 4294966784 }
  0x91   :  { %63 = vsyncpa [#allocation1], 1 }

</bundles_post_ra>
